<compile_context>
chip_gen: v7x
topology: tpu7x:2x2x1
jax: 0.10.0
libtpu: 0.0.40
codegen_flags: <defaults>
</compile_context>

<pallas_src>
import functools
import math

import jax
import jax.numpy as jnp
from jax import lax
from jax.experimental import pallas as pl
from jax.experimental.pallas import tpu as pltpu


def _rup(x, m):
    return ((x + m - 1) // m) * m


def _tile(d):
    """Output/M/N tile: single full-extent block when small, else 512/256."""
    if d <= 512:
        return d
    return 512 if d % 512 == 0 else 256


def _k_plan(k):
    """K padding plan: no padding (single K step) when small, else pad to 256-mult."""
    if k <= 2048:
        return k, k
    kp = _rup(k, 256)
    return kp, 256


def _row_tile(r):
    return r if r <= 512 else 512


# ---------------------------------------------------------------------------
# Pallas kernels
# ---------------------------------------------------------------------------
def _mm_kernel(a_ref, b_ref, bias_ref, o_ref, acc_ref, *, nk, act):
    @pl.when(pl.program_id(2) == 0)
    def _init():
        acc_ref[...] = jnp.zeros_like(acc_ref)

    acc_ref[...] += jnp.dot(a_ref[...], b_ref[...], preferred_element_type=jnp.float32)

    @pl.when(pl.program_id(2) == nk - 1)
    def _fin():
        r = acc_ref[...] + bias_ref[...]
        if act == "relu":
            r = jnp.maximum(r, 0.0)
        elif act == "swish":
            r = r * jax.nn.sigmoid(r)
        o_ref[...] = r.astype(o_ref.dtype)


@functools.partial(jax.jit, static_argnames=("act",))
def pl_matmul(a, b, bias=None, act="none"):
    """(M, K) @ (K, N) + bias (+ fused act). bf16 MXU operands, f32 accumulation."""
    M, K = a.shape
    K2, N = b.shape
    assert K == K2
    a = a.astype(jnp.bfloat16)
    b = b.astype(jnp.bfloat16)
    Kp, tk = _k_plan(K)
    if Kp != K:
        a = jnp.pad(a, ((0, 0), (0, Kp - K)))
        b = jnp.pad(b, ((0, Kp - K), (0, 0)))
    tm, tn = _tile(M), _tile(N)
    nk = Kp // tk
    if bias is None:
        bias = jnp.zeros((N,), jnp.float32)
    bias2 = bias.astype(jnp.float32).reshape(1, N)
    return pl.pallas_call(
        functools.partial(_mm_kernel, nk=nk, act=act),
        out_shape=jax.ShapeDtypeStruct((M, N), jnp.float32),
        grid_spec=pltpu.PrefetchScalarGridSpec(
            num_scalar_prefetch=0,
            grid=(pl.cdiv(M, tm), pl.cdiv(N, tn), nk),
            in_specs=[
                pl.BlockSpec((tm, tk), lambda i, j, k: (i, k)),
                pl.BlockSpec((tk, tn), lambda i, j, k: (k, j)),
                pl.BlockSpec((1, tn), lambda i, j, k: (0, j)),
            ],
            out_specs=pl.BlockSpec((tm, tn), lambda i, j, k: (i, j)),
            scratch_shapes=[pltpu.VMEM((tm, tn), jnp.float32)],
        ),
        compiler_params=pltpu.CompilerParams(
            dimension_semantics=("parallel", "parallel", "arbitrary")),
    )(a, b, bias2)


def _bmm_kernel(a_ref, b_ref, o_ref, acc_ref, *, nk):
    @pl.when(pl.program_id(3) == 0)
    def _init():
        acc_ref[...] = jnp.zeros_like(acc_ref)

    acc_ref[...] += jnp.dot(a_ref[0], b_ref[0], preferred_element_type=jnp.float32)

    @pl.when(pl.program_id(3) == nk - 1)
    def _fin():
        o_ref[0] = acc_ref[...]


@jax.jit
def pl_bmm(a, b):
    """Batched matmul (G, M, K) @ (G, K, N) -> (G, M, N), bf16 in / f32 out."""
    G, M, K = a.shape
    _, K2, N = b.shape
    assert K == K2
    a = a.astype(jnp.bfloat16)
    b = b.astype(jnp.bfloat16)
    Kp, tk = _k_plan(K)
    if Kp != K:
        a = jnp.pad(a, ((0, 0), (0, 0), (0, Kp - K)))
        b = jnp.pad(b, ((0, 0), (0, Kp - K), (0, 0)))
    tm, tn = _tile(M), _tile(N)
    nk = Kp // tk
    return pl.pallas_call(
        functools.partial(_bmm_kernel, nk=nk),
        out_shape=jax.ShapeDtypeStruct((G, M, N), jnp.float32),
        grid_spec=pltpu.PrefetchScalarGridSpec(
            num_scalar_prefetch=0,
            grid=(G, pl.cdiv(M, tm), pl.cdiv(N, tn), nk),
            in_specs=[
                pl.BlockSpec((1, tm, tk), lambda g, i, j, k: (g, i, k)),
                pl.BlockSpec((1, tk, tn), lambda g, i, j, k: (g, k, j)),
            ],
            out_specs=pl.BlockSpec((1, tm, tn), lambda g, i, j, k: (g, i, j)),
            scratch_shapes=[pltpu.VMEM((tm, tn), jnp.float32)],
        ),
        compiler_params=pltpu.CompilerParams(
            dimension_semantics=("parallel", "parallel", "parallel", "arbitrary")),
    )(a, b)


def _ln_kernel(x_ref, g_ref, b_ref, o_ref):
    x = x_ref[...]
    mu = jnp.mean(x, axis=-1, keepdims=True)
    var = jnp.mean(jnp.square(x - mu), axis=-1, keepdims=True)
    y = (x - mu) * lax.rsqrt(var + 1e-5)
    o_ref[...] = y * g_ref[...] + b_ref[...]


@jax.jit
def pl_layernorm(x, p):
    shape = x.shape
    D = shape[-1]
    x2 = x.reshape(-1, D).astype(jnp.float32)
    R = x2.shape[0]
    rb = _row_tile(R)
    out = pl.pallas_call(
        _ln_kernel,
        out_shape=jax.ShapeDtypeStruct((R, D), jnp.float32),
        grid_spec=pltpu.PrefetchScalarGridSpec(
            num_scalar_prefetch=0,
            grid=(pl.cdiv(R, rb),),
            in_specs=[
                pl.BlockSpec((rb, D), lambda i: (i, 0)),
                pl.BlockSpec((1, D), lambda i: (0, 0)),
                pl.BlockSpec((1, D), lambda i: (0, 0)),
            ],
            out_specs=pl.BlockSpec((rb, D), lambda i: (i, 0)),
        ),
        compiler_params=pltpu.CompilerParams(dimension_semantics=("parallel",)),
    )(x2, p["gamma"].reshape(1, D).astype(jnp.float32),
      p["beta"].reshape(1, D).astype(jnp.float32))
    return out.reshape(shape)


def _softmax_kernel(x_ref, o_ref):
    x = x_ref[...]
    m = jnp.max(x, axis=-1, keepdims=True)
    e = jnp.exp(x - m)
    denom = jnp.sum(e, axis=-1, keepdims=True)
    o_ref[...] = e * pl.reciprocal(denom, approx=True)


@jax.jit
def pl_softmax(x):
    shape = x.shape
    D = shape[-1]
    x2 = x.reshape(-1, D).astype(jnp.float32)
    R = x2.shape[0]
    rb = _row_tile(R)
    out = pl.pallas_call(
        _softmax_kernel,
        out_shape=jax.ShapeDtypeStruct((R, D), jnp.float32),
        grid_spec=pltpu.PrefetchScalarGridSpec(
            num_scalar_prefetch=0,
            grid=(pl.cdiv(R, rb),),
            in_specs=[pl.BlockSpec((rb, D), lambda i: (i, 0))],
            out_specs=pl.BlockSpec((rb, D), lambda i: (i, 0)),
        ),
        compiler_params=pltpu.CompilerParams(dimension_semantics=("parallel",)),
    )(x2)
    return out.reshape(shape)


def _dwconv_kernel(x_ref, w_ref, b_ref, s_ref, t_ref, o_ref, *, K, T):
    """Depthwise temporal conv + bias + eval-BN affine + swish, whole seq per batch."""
    y = x_ref[0]                                     # (T + K - 1, D)
    acc = jnp.zeros(o_ref.shape[1:], jnp.float32)    # (T, D)
    for k in range(K):
        acc = acc + y[k:k + T, :] * w_ref[k, :][None, :]
    acc = acc + b_ref[...]
    acc = acc * s_ref[...] + t_ref[...]
    o_ref[0] = acc * jax.nn.sigmoid(acc)


@functools.partial(jax.jit, static_argnames=("stride",))
def pl_depthwise_bn_swish(x, w, b, scale, shift, stride):
    """x: (B, T, D). Fused depthwise conv (same pad) + bias + BN affine + swish.
    stride > 1 is handled by computing the stride-1 output then subsampling
    (the pointwise epilogue commutes with temporal subsampling)."""
    B, T, D = x.shape
    K = w.shape[0]
    pad = (K - 1) // 2
    xp = jnp.pad(x.astype(jnp.float32), ((0, 0), (pad, pad), (0, 0)))
    T_pad = T + 2 * pad
    out = pl.pallas_call(
        functools.partial(_dwconv_kernel, K=K, T=T),
        out_shape=jax.ShapeDtypeStruct((B, T, D), jnp.float32),
        grid_spec=pltpu.PrefetchScalarGridSpec(
            num_scalar_prefetch=0,
            grid=(B,),
            in_specs=[
                pl.BlockSpec((1, T_pad, D), lambda i: (i, 0, 0)),
                pl.BlockSpec((K, D), lambda i: (0, 0)),
                pl.BlockSpec((1, D), lambda i: (0, 0)),
                pl.BlockSpec((1, D), lambda i: (0, 0)),
                pl.BlockSpec((1, D), lambda i: (0, 0)),
            ],
            out_specs=pl.BlockSpec((1, T, D), lambda i: (i, 0, 0)),
        ),
        compiler_params=pltpu.CompilerParams(dimension_semantics=("parallel",)),
    )(xp, w.astype(jnp.float32), b.reshape(1, D).astype(jnp.float32),
      scale.reshape(1, D).astype(jnp.float32), shift.reshape(1, D).astype(jnp.float32))
    if stride > 1:
        out = out[:, ::stride]
    return out


# ---------------------------------------------------------------------------
# Parameter containers / glue layers
# ---------------------------------------------------------------------------
class KeyGen:
    def __init__(self, seed):
        self.key = jax.random.PRNGKey(seed)

    def __call__(self):
        self.key, sub = jax.random.split(self.key)
        return sub


def init_linear(kg, din, dout, bias=True):
    p = {"w": jax.random.normal(kg(), (din, dout), jnp.float32) / math.sqrt(din)}
    if bias:
        p["b"] = jnp.zeros((dout,), jnp.float32)
    return p


def linear(x, p, act="none"):
    shp = x.shape
    out = pl_matmul(x.reshape(-1, shp[-1]), p["w"], bias=p.get("b"), act=act)
    return out.reshape(shp[:-1] + (p["w"].shape[1],))


def init_conv(kg, cout, cin, *ks):
    fan_in = cin * int(math.prod(ks))
    return {"w": jax.random.normal(kg(), (cout, cin) + tuple(ks), jnp.float32) / math.sqrt(fan_in),
            "b": jnp.zeros((cout,), jnp.float32)}


def init_bn(c):
    return {"gamma": jnp.ones((c,), jnp.float32), "beta": jnp.zeros((c,), jnp.float32),
            "mean": jnp.zeros((c,), jnp.float32), "var": jnp.ones((c,), jnp.float32)}


def init_ln(d):
    return {"gamma": jnp.ones((d,), jnp.float32), "beta": jnp.zeros((d,), jnp.float32)}


def fold_bn_conv(conv_p, bn_p, eps=1e-5):
    """Fold eval-mode BatchNorm into the conv: returns (CK, O) weight matrix + bias."""
    w = conv_p["w"]                                   # (O, C, *ks)
    O = w.shape[0]
    scale = bn_p["gamma"] * lax.rsqrt(bn_p["var"] + eps)
    w_f = w * scale.reshape((O,) + (1,) * (w.ndim - 1))
    b_f = (conv_p["b"] - bn_p["mean"]) * scale + bn_p["beta"]
    return w_f.reshape(O, -1).T, b_f


def conv2d_nhwc(x, w_mat, b, ksize, stride, padding, act="none"):
    """x: (N, H, W, C); w_mat: (C*k*k, O). im2col patches (channel-major) + MXU matmul."""
    N, H, W, C = x.shape
    O = w_mat.shape[1]
    if ksize == 1:
        xs = x[:, ::stride, ::stride, :]
        Ho, Wo = xs.shape[1], xs.shape[2]
        out = pl_matmul(xs.reshape(-1, C), w_mat, bias=b, act=act)
        return out.reshape(N, Ho, Wo, O)
    # TODO(synk): im2col patch extraction stays in XLA glue (bf16 to halve traffic);
    # an in-kernel shifted-window conv would remove the k*k read blow-up entirely.
    patches = lax.conv_general_dilated_patches(
        x.astype(jnp.bfloat16), (ksize, ksize), (stride, stride),
        padding=[(padding, padding), (padding, padding)],
        dimension_numbers=("NHWC", "HWIO", "NHWC"))
    _, Ho, Wo, CK = patches.shape
    out = pl_matmul(patches.reshape(-1, CK), w_mat, bias=b, act=act)
    return out.reshape(N, Ho, Wo, O)


def conv3d_nhwc(x, w_mat, b, ksize, strides, padding, act="none"):
    """x: (N, D, H, W, C); w_mat: (C*kd*kh*kw, O)."""
    N = x.shape[0]
    O = w_mat.shape[1]
    patches = lax.conv_general_dilated_patches(
        x.astype(jnp.bfloat16), tuple(ksize), tuple(strides),
        padding=[(padding[0], padding[0]), (padding[1], padding[1]),
                 (padding[2], padding[2])],
        dimension_numbers=("NDHWC", "DHWIO", "NDHWC"))
    _, Do, Ho, Wo, CK = patches.shape
    out = pl_matmul(patches.reshape(-1, CK), w_mat, bias=b, act=act)
    return out.reshape(N, Do, Ho, Wo, O)


# ---------------------------------------------------------------------------
# Relative-position multi-head attention (regular + patch)
# ---------------------------------------------------------------------------
def init_relpos_mha(kg, dim, heads, att_type="regular", patch_size=1):
    dh = dim // heads
    return {"heads": heads, "type": att_type, "patch_size": patch_size,
            "q": init_linear(kg, dim, dim), "k": init_linear(kg, dim, dim),
            "v": init_linear(kg, dim, dim), "o": init_linear(kg, dim, dim),
            "pos": init_linear(kg, dim, dim, bias=False),
            "u": 0.02 * jax.random.normal(kg(), (heads, dh), jnp.float32),
            "vb": 0.02 * jax.random.normal(kg(), (heads, dh), jnp.float32)}


def sinusoidal_relpos(T, dim):
    pos = jnp.arange(T - 1, -T, -1, dtype=jnp.float32)              # +(T-1) ... -(T-1)
    inv = jnp.power(10000.0, jnp.arange(0, dim, 2, dtype=jnp.float32) / dim)
    ang = pos[:, None] / inv[None, :]
    pe = jnp.zeros((2 * T - 1, dim), jnp.float32)
    pe = pe.at[:, 0::2].set(jnp.sin(ang))
    pe = pe.at[:, 1::2].set(jnp.cos(ang))
    return pe


def _relpos_core(q, k, v, p, mask):
    B, T, D = q.shape
    H = p["heads"]
    dh = D // H
    qh = q.reshape(B, T, H, dh).transpose(0, 2, 1, 3)
    kh = k.reshape(B, T, H, dh).transpose(0, 2, 1, 3)
    vh = v.reshape(B, T, H, dh).transpose(0, 2, 1, 3)
    pe = sinusoidal_relpos(T, D)
    pemb = pl_matmul(pe, p["pos"]["w"]).reshape(2 * T - 1, H, dh).transpose(1, 0, 2)
    qc = (qh + p["u"][None, :, None, :]).reshape(B * H, T, dh)
    qp = (qh + p["vb"][None, :, None, :]).reshape(B * H, T, dh)
    ac = pl_bmm(qc, kh.reshape(B * H, T, dh).transpose(0, 2, 1)).reshape(B, H, T, T)
    pb = jnp.broadcast_to(pemb[None], (B, H, 2 * T - 1, dh)).reshape(B * H, 2 * T - 1, dh)
    bd_full = pl_bmm(qp, pb.transpose(0, 2, 1)).reshape(B, H, T, 2 * T - 1)
    # TODO(synk): relative-shift gather kept in XLA glue (take_along_axis).
    idx = (T - 1) - jnp.arange(T)[:, None] + jnp.arange(T)[None, :]
    bd = jnp.take_along_axis(
        bd_full, jnp.broadcast_to(idx[None, None], (B, H, T, T)), axis=-1)
    att = (ac + bd) * (1.0 / math.sqrt(dh))
    if mask is not None:
        att = jnp.where(mask, att, -1e9)
    att = pl_softmax(att)
    ctx = pl_bmm(att.reshape(B * H, T, T), vh.reshape(B * H, T, dh)).reshape(B, H, T, dh)
    return ctx.transpose(0, 2, 1, 3).reshape(B, T, D)


def mhsa_forward(x, p, mask):
    q, k, v = linear(x, p["q"]), linear(x, p["k"]), linear(x, p["v"])
    if p["type"] == "patch":
        # TODO(synk): original RelPosPatch1dMultiHeadAttention uses AvgPool1d/Upsample;
        # approximated with zero-padded mean pooling + nearest upsampling.
        ps = p["patch_size"]
        B, T, D = x.shape
        Tp = _rup(T, ps)

        def pool(z):
            zp = jnp.pad(z, ((0, 0), (0, Tp - T), (0, 0)))
            return zp.reshape(B, Tp // ps, ps, D).mean(axis=2)

        m = None if mask is None else mask[:, :, ::ps, ::ps]
        ctx = _relpos_core(pool(q), pool(k), pool(v), p, m)
        ctx = jnp.repeat(ctx, ps, axis=1)[:, :T]
    else:
        ctx = _relpos_core(q, k, v, p, mask)
    return linear(ctx, p["o"])


# ---------------------------------------------------------------------------
# Conformer block / ConformerInterCTC
# ---------------------------------------------------------------------------
def init_conformer_block(kg, dim_in, dim_out, ff_ratio, att_cfg, kernel_size, stride,
                         heads=4):
    p = {"stride": stride, "dim_in": dim_in, "dim_out": dim_out}
    p["ff1"] = {"ln": init_ln(dim_in),
                "lin1": init_linear(kg, dim_in, dim_in * ff_ratio),
                "lin2": init_linear(kg, dim_in * ff_ratio, dim_in)}
    p["mhsa_ln"] = init_ln(dim_in)
    p["att"] = init_relpos_mha(kg, dim_in, heads, att_cfg.get("type", "regular"),
                               att_cfg.get("patch_size", 1))
    p["conv"] = {"ln": init_ln(dim_in),
                 "pw1": init_linear(kg, dim_in, 2 * dim_out),
                 "dw_w": jax.random.normal(kg(), (kernel_size, dim_out), jnp.float32)
                 / math.sqrt(kernel_size),
                 "dw_b": jnp.zeros((dim_out,), jnp.float32),
                 "bn": init_bn(dim_out),
                 "pw2": init_linear(kg, dim_out, dim_out)}
    if dim_in != dim_out:
        p["res_proj"] = init_linear(kg, dim_in, dim_out)
    p["ff2"] = {"ln": init_ln(dim_out),
                "lin1": init_linear(kg, dim_out, dim_out * ff_ratio),
                "lin2": init_linear(kg, dim_out * ff_ratio, dim_out)}
    p["norm"] = init_ln(dim_out)
    return p


def ffn_forward(x, p):
    y = pl_layernorm(x, p["ln"])
    y = linear(y, p["lin1"], act="swish")
    return linear(y, p["lin2"])


def conv_module_forward(x, p, stride):
    y = pl_layernorm(x, p["ln"])
    y = linear(y, p["pw1"])
    a, g = jnp.split(y, 2, axis=-1)
    y = a * jax.nn.sigmoid(g)                            # GLU
    eps = 1e-5
    scale = p["bn"]["gamma"] * lax.rsqrt(p["bn"]["var"] + eps)
    shift = p["bn"]["beta"] - p["bn"]["mean"] * scale
    y = pl_depthwise_bn_swish(y, p["dw_w"], p["dw_b"], scale, shift, stride)
    return linear(y, p["pw2"])


def conformer_block_forward(x, p, mask):
    stride = p["stride"]
    x = x + 0.5 * ffn_forward(x, p["ff1"])
    x = x + mhsa_forward(pl_layernorm(x, p["mhsa_ln"]), p["att"], mask)
    res = x[:, ::stride]
    if "res_proj" in p:
        # TODO(synk): exact residual path of the strided/expanding ConvolutionModule is
        # approximated with a strided pointwise Linear projection.
        res = linear(res, p["res_proj"])
    x = conv_module_forward(x, p["conv"], stride) + res
    x = x + 0.5 * ffn_forward(x, p["ff2"])
    return pl_layernorm(x, p["norm"])


def init_conformer_interctc(kg, dim_model, num_blocks, interctc_blocks, vocab_size,
                            att_cfg, kernel_size, conv_stride, loss_prefix):
    if isinstance(dim_model, int):
        dim_model = [dim_model]
    if isinstance(num_blocks, int):
        num_blocks = [num_blocks]
    blocks, inter = [], {}
    i = 1
    for stage_id in range(len(num_blocks)):
        for block_id in range(num_blocks[stage_id]):
            down = (block_id == num_blocks[stage_id] - 1) and (stage_id < len(num_blocks) - 1)
            d_in = dim_model[stage_id]
            d_out = dim_model[stage_id + (1 if down else 0)]
            stride = conv_stride if down else 1
            cfg = att_cfg[stage_id] if isinstance(att_cfg, list) else att_cfg
            blocks.append(init_conformer_block(kg, d_in, d_out, 4, cfg, kernel_size, stride))
            if i in interctc_blocks:
                inter[i - 1] = {"proj1": init_linear(kg, d_out, vocab_size),
                                "proj2": init_linear(kg, vocab_size, d_out)}
            i += 1
    return {"blocks": blocks, "inter": inter,
            "interctc_blocks": list(interctc_blocks), "loss_prefix": loss_prefix}


def conformer_interctc_forward(x, lengths, p):
    B, T, _ = x.shape
    valid = jnp.arange(T)[None, :] < lengths[:, None]
    mask = jnp.broadcast_to(valid[:, None, None, :], (B, 1, T, T))   # attentions.Mask()
    interctc = {}
    for i, bp in enumerate(p["blocks"]):
        x = conformer_block_forward(x, bp, mask)
        if (i + 1) in p["interctc_blocks"]:
            ip = p["inter"][i]
            logits = linear(x, ip["proj1"])
            x = x + linear(pl_softmax(logits), ip["proj2"])          # InterCTCResModule
            key = p["loss_prefix"] + "_" + str(i)
        else:
            logits = None
        if bp["stride"] > 1:
            mask = mask[:, :, ::bp["stride"], ::bp["stride"]]
            lengths = (lengths - 1) // bp["stride"] + 1
        if logits is not None:
            interctc[key] = [logits, lengths]
    return x, lengths, interctc


# ---------------------------------------------------------------------------
# Audio preprocessing (mel spectrogram)
# ---------------------------------------------------------------------------
def mel_filterbank(n_mels, n_fft, sr):
    n_freqs = n_fft // 2 + 1

    def hz2mel(f):
        return 2595.0 * jnp.log10(1.0 + f / 700.0)

    def mel2hz(m):
        return 700.0 * (jnp.power(10.0, m / 2595.0) - 1.0)

    freqs = jnp.linspace(0.0, sr / 2.0, n_freqs)
    m_pts = jnp.linspace(hz2mel(0.0), hz2mel(sr / 2.0), n_mels + 2)
    f_pts = mel2hz(m_pts)
    f_diff = f_pts[1:] - f_pts[:-1]
    slopes = f_pts[None, :] - freqs[:, None]
    down = -slopes[:, :-2] / f_diff[:-1]
    up = slopes[:, 2:] / f_diff[1:]
    return jnp.maximum(0.0, jnp.minimum(down, up))       # (n_freqs, n_mels)


def audio_preprocessing(wav, lengths):
    sr, n_fft, hop, win, n_mels = 16000, 512, 160, 400, 80
    B = wav.shape[0]
    pad = n_fft // 2
    x = jnp.pad(wav, ((0, 0), (pad, pad)), mode="reflect")
    n_frames = 1 + (x.shape[1] - n_fft) // hop
    idx = jnp.arange(n_frames)[:, None] * hop + jnp.arange(n_fft)[None, :]
    frames = x[:, idx]
    hann = 0.5 * (1.0 - jnp.cos(2.0 * jnp.pi * jnp.arange(win) / win))
    lpad = (n_fft - win) // 2
    window = jnp.zeros((n_fft,), jnp.float32).at[lpad:lpad + win].set(hann)
    # TODO(synk): STFT framing + rFFT kept in JAX glue (no Pallas FFT primitive);
    # the mel-filterbank projection below runs on the Pallas matmul.
    spec = jnp.fft.rfft(frames * window, axis=-1)
    power = jnp.abs(spec).astype(jnp.float32) ** 2
    fb = mel_filterbank(n_mels, n_fft, sr)
    n_freqs = n_fft // 2 + 1
    mel = pl_matmul(power.reshape(-1, n_freqs), fb).reshape(B, n_frames, n_mels)
    x = jnp.log(mel + 1e-9)                              # (B, frames, n_mels)
    lengths = lengths // hop + 1
    return x, lengths


# ---------------------------------------------------------------------------
# Audio encoder
# ---------------------------------------------------------------------------
def init_audio_encoder(kg, vocab_size, interctc_blocks, num_blocks, loss_prefix):
    n_mels, filters = 80, 180
    return {
        "sub_conv": init_conv(kg, filters, 1, 3, 3),
        "sub_bn": init_bn(filters),
        "linear": init_linear(kg, filters * n_mels // 2, 180),
        "back_end": init_conformer_interctc(
            kg, [180, 256, 360], num_blocks, interctc_blocks, vocab_size,
            [{"type": "patch", "patch_size": 3}, {"type": "regular"}, {"type": "regular"}],
            15, 2, loss_prefix),
    }


def audio_encoder_forward(audio, lengths, p):
    x, lengths = audio_preprocessing(audio, lengths)     # (B, frames, 80)
    # SpecAugment + Dropout: train-time only -> identity here (eval forward).
    x = jnp.transpose(x, (0, 2, 1))[..., None]           # (B, 80, frames, 1) NHWC
    w, b = fold_bn_conv(p["sub_conv"], p["sub_bn"])      # BN folded into the conv
    x = conv2d_nhwc(x, w, b, 3, 2, 1, act="swish")       # (B, 40, frames/2, 180)
    lengths = (lengths - 1) // 2 + 1
    B, F2, T2, C = x.shape
    x = jnp.transpose(x, (0, 2, 3, 1)).reshape(B, T2, C * F2)   # (B, T, 7200), C-major
    x = linear(x, p["linear"])                           # (B, T, 180)
    return conformer_interctc_forward(x, lengths, p["back_end"])


# ---------------------------------------------------------------------------
# ResNet18 / video encoder (NHWC internally, eval-BN folded into convs)
# ---------------------------------------------------------------------------
def init_resnet18(kg, dim_output):
    dims, nb = [64, 128, 256, 512], [2, 2, 2, 2]
    blocks, in_c = [], 64
    for s in range(4):
        for b in range(nb[s]):
            stride = 2 if (b == 0 and s > 0) else 1
            out_c = dims[s]
            bp = {"stride": stride,
                  "conv1": init_conv(kg, out_c, in_c, 3, 3), "bn1": init_bn(out_c),
                  "conv2": init_conv(kg, out_c, out_c, 3, 3), "bn2": init_bn(out_c)}
            if stride != 1 or in_c != out_c:
                bp["down_conv"] = init_conv(kg, out_c, in_c, 1, 1)
                bp["down_bn"] = init_bn(out_c)
            blocks.append(bp)
            in_c = out_c
    return {"blocks": blocks, "head": init_linear(kg, 512, dim_output)}


def resnet18_forward(x, p):
    # x: (N, H, W, C)
    for bp in p["blocks"]:
        w1, b1 = fold_bn_conv(bp["conv1"], bp["bn1"])
        w2, b2 = fold_bn_conv(bp["conv2"], bp["bn2"])
        y = conv2d_nhwc(x, w1, b1, 3, bp["stride"], 1, act="relu")
        y = conv2d_nhwc(y, w2, b2, 3, 1, 1)
        if "down_conv" in bp:
            wd, bd = fold_bn_conv(bp["down_conv"], bp["down_bn"])
            r = conv2d_nhwc(x, wd, bd, 1, bp["stride"], 0)
        else:
            r = x
        x = jnp.maximum(y + r, 0.0)                      # joined post-act
    x = x.mean(axis=(1, 2))                              # GlobalAvgPool2d
    return linear(x, p["head"])


def init_video_encoder(kg, vocab_size, interctc_blocks, num_blocks, loss_prefix):
    return {
        "front_conv": init_conv(kg, 64, 1, 5, 7, 7),
        "front_bn": init_bn(64),
        "resnet": init_resnet18(kg, 256),
        "back_end": init_conformer_interctc(
            kg, [256, 360], num_blocks, interctc_blocks, vocab_size,
            {"type": "regular"}, 15, 2, loss_prefix),
    }


def video_encoder_forward(video, lengths, p):
    # video: (B, 1, T, H, W) NCDHW at the module boundary -> NDHWC internally.
    B, _, T, _, _ = video.shape
    x = jnp.transpose(video, (0, 2, 3, 4, 1))            # (B, T, H, W, 1)
    w3, b3 = fold_bn_conv(p["front_conv"], p["front_bn"])
    x = conv3d_nhwc(x, w3, b3, (5, 7, 7), (1, 2, 2), (2, 3, 3), act="relu")
    # TODO(synk): MaxPool3d window reduction kept in JAX glue (lax.reduce_window).
    x = lax.reduce_window(x, -jnp.inf, lax.max, (1, 1, 3, 3, 1), (1, 1, 2, 2, 1), "SAME")
    _, T_, H2, W2, C2 = x.shape
    x = x.reshape(B * T_, H2, W2, C2)                    # VideoToImages (no transpose)
    x = resnet18_forward(x, p["resnet"])                 # (B*T, 256)
    x = x.reshape(B, T_, -1)                             # ImagesToVideos
    return conformer_interctc_forward(x, lengths, p["back_end"])


# ---------------------------------------------------------------------------
# Fusion module + full AV encoder
# ---------------------------------------------------------------------------
def init_fusion(kg, a_dim, v_dim, f_dim):
    return {"ln": init_ln(a_dim + v_dim), "lin": init_linear(kg, a_dim + v_dim, f_dim)}


def fusion_forward(audio, video, p):
    # TODO(synk): exact FusionModule internals not in the reference; implemented as the
    # AVEC paper's "joint feed-forward": concat -> LayerNorm -> Linear -> Swish.
    T = min(audio.shape[1], video.shape[1])
    x = jnp.concatenate([audio[:, :T], video[:, :T]], axis=-1)
    x = pl_layernorm(x, p["ln"])
    return linear(x, p["lin"], act="swish")


def init_av_encoder(kg, vocab_size=256, v_interctc_blocks=(3, 6),
                    a_interctc_blocks=(8, 11), f_interctc_blocks=(2,)):
    dim_model = 360
    return {
        "video": init_video_encoder(kg, vocab_size, list(v_interctc_blocks), [6, 1], "v_ctc"),
        "audio": init_audio_encoder(kg, vocab_size, list(a_interctc_blocks), [5, 6, 1], "a_ctc"),
        "fusion": init_fusion(kg, dim_model, dim_model, dim_model),
        "av": init_conformer_interctc(kg, dim_model, 5, list(f_interctc_blocks), vocab_size,
                                      {"type": "regular"}, 15, 2, "f_ctc"),
        "head": init_linear(kg, dim_model, vocab_size),
    }


def av_encoder_forward(video, video_len, audio, audio_len, p):
    v, v_len, v_inter = video_encoder_forward(video, video_len, p["video"])
    a, a_len, a_inter = audio_encoder_forward(audio, audio_len, p["audio"])
    x = fusion_forward(a, v, p["fusion"])
    lengths = a_len
    x, lengths, inter = conformer_interctc_forward(x, lengths, p["av"])
    inter.update(v_inter)
    inter.update(a_inter)
    x = linear(x, p["head"])
    return x, lengths, inter


# ---------------------------------------------------------------------------
if __name__ == "__main__":
    kg = KeyGen(42)
    params = init_av_encoder(kg, vocab_size=256)

    key = jax.random.PRNGKey(0)
    k_v, k_a = jax.random.split(key)
    B = 2
    T_video, H, W = 8, 32, 32
    L_audio = 31 * 160                                   # 4960 samples -> 32 mel frames
    video = jax.random.normal(k_v, (B, 1, T_video, H, W), jnp.float32)
    audio = 0.1 * jax.random.normal(k_a, (B, L_audio), jnp.float32)
    video_len = jnp.full((B,), T_video, jnp.int32)
    audio_len = jnp.full((B,), L_audio, jnp.int32)

    x, lengths, inter = av_encoder_forward(video, video_len, audio, audio_len, params)
    x = jax.block_until_ready(x)
    lengths = jax.block_until_ready(lengths)
    for k in inter:
        jax.block_until_ready(inter[k][0])

    assert x.shape == (B, 4, 256), x.shape
    assert int(lengths[0]) == 4
    print("KERNEL_OK")
</pallas_src>

<mosaic_0001>
module attributes {stable_mosaic.version = 11 : i64} {
  func.func @_mm_kernel(%arg0: i32, %arg1: i32, %arg2: i32, %arg3: memref<512x245xbf16, #tpu.memory_space<vmem>>, %arg4: memref<245x64xbf16, #tpu.memory_space<vmem>>, %arg5: memref<1x64xf32, #tpu.memory_space<vmem>>, %arg6: memref<512x64xf32, #tpu.memory_space<vmem>>, %arg7: memref<512x64xf32, #tpu.memory_space<vmem>>) attributes {dimension_semantics = [#tpu.dimension_semantics<parallel>, #tpu.dimension_semantics<parallel>, #tpu.dimension_semantics<arbitrary>], iteration_bounds = array<i64: 8, 1, 1>, scalar_prefetch = 0 : i64, scratch_operands = 1 : i64, tpu.core_type = #tpu.core_type<tc>, window_params = [{transform_indices = @transform_0, window_bounds = array<i64: 512, 245>}, {transform_indices = @transform_1, window_bounds = array<i64: 245, 64>}, {transform_indices = @transform_2, window_bounds = array<i64: 1, 64>}, {transform_indices = @transform_3, window_bounds = array<i64: 512, 64>}]} {
    %c0_i32 = arith.constant 0 : i32
    %0 = arith.cmpi eq, %arg2, %c0_i32 : i32
    %1 = arith.extui %0 : i1 to i32
    %c0_i32_0 = arith.constant 0 : i32
    %2 = arith.cmpi ne, %1, %c0_i32_0 : i32
    scf.if %2 {
      %cst_10 = arith.constant 0.000000e+00 : f32
      %12 = vector.broadcast %cst_10 : f32 to vector<512x64xf32>
      %c0_11 = arith.constant 0 : index
      %c0_12 = arith.constant 0 : index
      %13 = vector.load %arg7[%c0_11, %c0_12] : memref<512x64xf32, #tpu.memory_space<vmem>>, vector<512x64xf32>
      tpu.vector_store %arg7[%c0_11, %c0_12], %12 {strides = array<i32>} : memref<512x64xf32, #tpu.memory_space<vmem>>, vector<512x64xf32>,
    } else {
    }
    %c0 = arith.constant 0 : index
    %c0_1 = arith.constant 0 : index
    %3 = vector.load %arg7[%c0, %c0_1] : memref<512x64xf32, #tpu.memory_space<vmem>>, vector<512x64xf32>
    %c0_2 = arith.constant 0 : index
    %c0_3 = arith.constant 0 : index
    %4 = vector.load %arg3[%c0_2, %c0_3] : memref<512x245xbf16, #tpu.memory_space<vmem>>, vector<512x245xbf16>
    %c0_4 = arith.constant 0 : index
    %c0_5 = arith.constant 0 : index
    %5 = vector.load %arg4[%c0_4, %c0_5] : memref<245x64xbf16, #tpu.memory_space<vmem>>, vector<245x64xbf16>
    %cst = arith.constant dense<0.000000e+00> : vector<512x64xf32>
    %6 = tpu.matmul %4, %5, %cst {dimension_numbers = #tpu.dot_dimension_numbers<[1], [0], [0], [1], [0, 0, 1, 1], [], []>} : vector<512x245xbf16>, vector<245x64xbf16>, vector<512x64xf32> -> vector<512x64xf32>
    %7 = arith.addf %3, %6 : vector<512x64xf32>
    %c0_6 = arith.constant 0 : index
    %c0_7 = arith.constant 0 : index
    %8 = vector.load %arg7[%c0_6, %c0_7] : memref<512x64xf32, #tpu.memory_space<vmem>>, vector<512x64xf32>
    tpu.vector_store %arg7[%c0_6, %c0_7], %7 {strides = array<i32>} : memref<512x64xf32, #tpu.memory_space<vmem>>, vector<512x64xf32>,
    %c0_i32_8 = arith.constant 0 : i32
    %9 = arith.cmpi eq, %arg2, %c0_i32_8 : i32
    %10 = arith.extui %9 : i1 to i32
    %c0_i32_9 = arith.constant 0 : i32
    %11 = arith.cmpi ne, %10, %c0_i32_9 : i32
    scf.if %11 {
      %c0_10 = arith.constant 0 : index
      %c0_11 = arith.constant 0 : index
      %12 = vector.load %arg7[%c0_10, %c0_11] : memref<512x64xf32, #tpu.memory_space<vmem>>, vector<512x64xf32>
      %c0_12 = arith.constant 0 : index
      %c0_13 = arith.constant 0 : index
      %13 = vector.load %arg5[%c0_12, %c0_13] : memref<1x64xf32, #tpu.memory_space<vmem>>, vector<1x64xf32>
      %14 = vector.broadcast %13 : vector<1x64xf32> to vector<512x64xf32>
      %15 = arith.addf %12, %14 : vector<512x64xf32>
      %cst_14 = arith.constant 0.000000e+00 : f32
      %16 = vector.broadcast %cst_14 : f32 to vector<512x64xf32>
      %17 = arith.maximumf %15, %16 : vector<512x64xf32>
      %c0_15 = arith.constant 0 : index
      %c0_16 = arith.constant 0 : index
      %18 = vector.load %arg6[%c0_15, %c0_16] : memref<512x64xf32, #tpu.memory_space<vmem>>, vector<512x64xf32>
      tpu.vector_store %arg6[%c0_15, %c0_16], %17 {strides = array<i32>} : memref<512x64xf32, #tpu.memory_space<vmem>>, vector<512x64xf32>,
    } else {
    }
    return
  }
  func.func @transform_0(%arg0: i32, %arg1: i32, %arg2: i32) -> (i32, i32) {
    %c0_i32 = arith.constant 0 : i32
    return %arg0, %arg2 : i32, i32
  }
  func.func @transform_1(%arg0: i32, %arg1: i32, %arg2: i32) -> (i32, i32) {
    %c0_i32 = arith.constant 0 : i32
    return %arg2, %arg1 : i32, i32
  }
  func.func @transform_2(%arg0: i32, %arg1: i32, %arg2: i32) -> (i32, i32) {
    %c0_i32 = arith.constant 0 : i32
    %c0_i32_0 = arith.constant 0 : i32
    return %c0_i32, %arg1 : i32, i32
  }
  func.func @transform_3(%arg0: i32, %arg1: i32, %arg2: i32) -> (i32, i32) {
    %c0_i32 = arith.constant 0 : i32
    return %arg0, %arg1 : i32, i32
  }
}

</mosaic_0001>

<bundles_post_ra>
// kernel: pl_matmul.1
= control target key start
LH: loop header
LB: loop body
LE: loop exit
PB: predicated region body
PF: predicated region fallthrough
CT: control target
= control target key end

     0   :  { %s2126_s12 = smov 0   ;;  %s2128_s13 = smov 0   ;;  %s2734_s0 = inlined_call_operand.vmem [shape: bf16[4096,245], index: 0, kind: input, shape index: {}]   ;;  %s2735_s1 = inlined_call_operand.vmem [shape: bf16[245,64], index: 1, kind: input, shape index: {}]   ;;  %s2736_s2 = inlined_call_operand.vmem [shape: f32[1,64], index: 2, kind: input, shape index: {}]   ;;  %s2737_s3 = inlined_call_operand.vmem [shape: f32[4096,64], index: 3, kind: output, shape index: {}]  }
   0x1   :  { %s2130_s14 = smov 0  }
   0x2 LB: > { %s32_s15 = sadd.s32 1, %s2097_s13  ;;  %p1785_p0 = scmp.ge.s32.totalorder %s2101_s14, 1  ;;  %s2101_s14 = sphi %s2130_s14, %s13_s14   ;;  %s2097_s13 = sphi %s2128_s13, %s2739_s13   ;;  %s2093_s12 = sphi %s2126_s12, %s2738_s12  }
   0x3   : > { %p34_p1 = scmp.ge.s32.totalorder %s32_s15, 8  ;;  %p191_p2 = scmp.lt.s32.totalorder %s2101_s14, 9 }
   0x5   : > { %s2741_s15 = smov (%p34_p1, %s32_s15), 0  ;;  %p192_p3 = pnand %p1785_p0, %p191_p2 }
   0x6   : > { %v1966_v0 = vld [vmem:[%s2735_s1] sm:$0xff] (!%p192_p3)   ;;  %v2103_v1 = vmov (!%p192_p3), 0   ;;  %v1967_v2 = vld [vmem:[%s2735_s1 + $0x8] sm:$0xff] (!%p192_p3)   ;;  %v1968_v3 = vld [vmem:[%s2735_s1 + $0x10] sm:$0xff] (!%p192_p3)   ;;  %s1786_s22 = sshll.u32 (!%p192_p3), %s2093_s12, 6  ;;  %vm877_vm0 = vcmask (!%p192_p3), 957440  }
   0x7   : > { %195 = sbr.rel (%p192_p3) target bundleno = 421 (0x1a5), region = 32  ;;  %981 = vmatprep.subr.bf16.mxu0 (!%p192_p3), %v2103_v1  ;;  %1907 = vmatprep.subr.bf16.mxu1 (!%p192_p3), %v2103_v1  ;;  %p236_p4 = scmp.lt.s32.totalorder (!%p192_p3), %s1786_s22, 511  ;;  %v1969_v4 = vld [vmem:[%s2735_s1 + $0x18] sm:$0xff] (!%p192_p3)   ;;  %v1970_v5 = vld [vmem:[%s2735_s1 + $0x20] sm:$0xff] (!%p192_p3)   ;;  %v1971_v7 = vld [vmem:[%s2735_s1 + $0x28] sm:$0xff] (!%p192_p3)   ;;  %vm974_vm1 = vcmask (!%p192_p3), 1041408  }
   0x8   : > { %982 = vmatpush1.bf16.msra.mxu0 (!%p192_p3), %v1966_v0  ;;  %1923 = vmatpush1.bf16.msra.mxu1 (!%p192_p3), %v1966_v0  ;;  %v1972_v9 = vld [vmem:[%s2735_s1 + $0x30] sm:$0xff] (!%p192_p3)   ;;  %v1973_v10 = vld [vmem:[%s2735_s1 + $0x38] sm:$0xff] (!%p192_p3)   ;;  %v1974_v11 = vld [vmem:[%s2735_s1 + $0x40] sm:$0xff] (!%p192_p3)   ;;  %vm975_vm2 = vcmask (!%p192_p3), 1042432   ;;  %v2104_v17 = vmov (!%p192_p3), 65535   ;;  %vm272_vm3 = vcmask (!%p192_p3), 523264  }
   0x9   : > { %983 = vmatprep.subr.bf16.mxu0 (!%p192_p3), %v2103_v1  ;;  %1908 = vmatprep.subr.bf16.mxu1 (!%p192_p3), %v2103_v1  ;;  %v1975_v12 = vld [vmem:[%s2735_s1 + $0x48] sm:$0xff] (!%p192_p3)   ;;  %v1976_v13 = vld [vmem:[%s2735_s1 + $0x50] sm:$0xff] (!%p192_p3)   ;;  %v1977_v14 = vld [vmem:[%s2735_s1 + $0x58] sm:$0xff] (!%p192_p3)   ;;  %v976_v18 = vsel (!%p192_p3), %vm974_vm1, 4294967295, %v2104_v17  ;;  %v2105_v23 = vmov (!%p192_p3), 0.0  }
   0xa   : > { %v1978_v15 = vld [vmem:[%s2735_s1 + $0x60] sm:$0xff] (!%p192_p3)   ;;  %v1979_v16 = vld [vmem:[%s2735_s1 + $0x68] sm:$0xff] (!%p192_p3)   ;;  %v1980_v19 = vld [vmem:[%s2735_s1 + $0x70] sm:$0xff] (!%p192_p3)   ;;  %v977_v21 = vsel (!%p192_p3), %vm975_vm2, %v976_v18, 0  ;;  %273 = vst.msk [vmem:[#allocation2] sm:$0xff] (!%p192_p3), %vm272_vm3, %v2105_v23 }
   0xb   : > { %v1981_v20 = vld [vmem:[%s2735_s1 + $0x78] ss:$0 sps:$4 sm:$0x77] (!%p192_p3)   ;;  %274 = vst.msk [vmem:[#allocation2 + $0x8] sm:$0xff] (!%p192_p3), %vm272_vm3, %v2105_v23  ;;  %275 = vst.msk [vmem:[#allocation2 + $0x10] sm:$0xff] (!%p192_p3), %vm272_vm3, %v2105_v23 }
   0xc   : > { %984 = vmatpush1.bf16.msra.mxu0 (!%p192_p3), %v1967_v2  ;;  %1924 = vmatpush1.bf16.msra.mxu1 (!%p192_p3), %v1967_v2  ;;  %v2236_v22 = vand.u32 (!%p192_p3), %v1981_v20, %v977_v21  ;;  %276 = vst.msk [vmem:[#allocation2 + $0x18] sm:$0xff] (!%p192_p3), %vm272_vm3, %v2105_v23  ;;  %277 = vst.msk [vmem:[#allocation2 + $0x20] sm:$0xff] (!%p192_p3), %vm272_vm3, %v2105_v23 }
   0xd   : > { %985 = vmatprep.subr.bf16.mxu0 (!%p192_p3), %v2103_v1  ;;  %1909 = vmatprep.subr.bf16.mxu1 (!%p192_p3), %v2103_v1  ;;  %278 = vst.msk [vmem:[#allocation2 + $0x28] sm:$0xff] (!%p192_p3), %vm272_vm3, %v2105_v23  ;;  %279 = vst.msk [vmem:[#allocation2 + $0x30] sm:$0xff] (!%p192_p3), %vm272_vm3, %v2105_v23 }
   0xe   : > { %s2743_s22 = smov (!%p236_p4, %s1786_s22), 511  ;;  %280 = vst.msk [vmem:[#allocation2 + $0x38] sm:$0xff] %vm272_vm3, %v2105_v23  ;;  %281 = vst.msk [vmem:[#allocation2 + $0x40] sm:$0xff] %vm272_vm3, %v2105_v23 }
   0xf   : > { %s1906_s25 = sshll.u32 %s2743_s22, 3  ;;  %282 = vst.msk [vmem:[#allocation2 + $0x48] sm:$0xff] %vm272_vm3, %v2105_v23  ;;  %283 = vst.msk [vmem:[#allocation2 + $0x50] sm:$0xff] %vm272_vm3, %v2105_v23 }
  0x10   : > { %986 = vmatpush1.bf16.msra.mxu0 %v1968_v3  ;;  %1925 = vmatpush1.bf16.msra.mxu1 %v1968_v3  ;;  %s2172_s28 = scalar_lea.vmem %s2734_s0, %s1906_s25  ;;  %284 = vst.msk [vmem:[#allocation2 + $0x58] sm:$0xff] %vm272_vm3, %v2105_v23  ;;  %285 = vst.msk [vmem:[#allocation2 + $0x60] sm:$0xff] %vm272_vm3, %v2105_v23  ;;  %s2480_s8 = scalar_lea.vmem %s2737_s3, %s1906_s25 }
  0x11   : > { %987 = vmatprep.subr.bf16.mxu0 %v2103_v1  ;;  %1910 = vmatprep.subr.bf16.mxu1 %v2103_v1  ;;  %v1984_v6 = vld [vmem:[%s2172_s28 + $0x4] ss:$8 sps:$4 sm:$0xff]   ;;  %286 = vst.msk [vmem:[#allocation2 + $0x68] sm:$0xff] %vm272_vm3, %v2105_v23  ;;  %287 = vst.msk [vmem:[#allocation2 + $0x70] sm:$0xff] %vm272_vm3, %v2105_v23  ;;  %v1982_v24 = vld [vmem:[%s2172_s28] ss:$8 sps:$4 sm:$0xff]  }
  0x12   : > { %v1987_v8 = vld [vmem:[%s2172_s28 + $0x104] ss:$8 sps:$4 sm:$0xff]   ;;  %1871 = vmatprep.mubr.msk.bf16.mxu0 %vm877_vm0, %v1984_v6  ;;  %288 = vst.msk [vmem:[#allocation2 + $0x78] sm:$0xff] %vm272_vm3, %v2105_v23  ;;  %289 = vst.msk [vmem:[#allocation2 + $0x80] sm:$0xff] %vm272_vm3, %v2105_v23  ;;  %v1985_v25 = vld [vmem:[%s2172_s28 + $0x100] ss:$8 sps:$4 sm:$0xff]  }
  0x13   : > { %1887 = vmatprep.mubr.msk.bf16.mxu1 %vm877_vm0, %v1987_v8  ;;  %290 = vst.msk [vmem:[#allocation2 + $0x88] sm:$0xff] %vm272_vm3, %v2105_v23  ;;  %291 = vst.msk [vmem:[#allocation2 + $0x90] sm:$0xff] %vm272_vm3, %v2105_v23  ;;  %v1988_v26 = vld [vmem:[%s2172_s28 + $0x14] ss:$8 sps:$4 sm:$0xff]   ;;  %v1992_v28 = vld [vmem:[%s2172_s28 + $0x10] ss:$8 sps:$4 sm:$0xff]  }
  0x14   : > { %988 = vmatpush1.bf16.msra.mxu0 %v1969_v4  ;;  %1926 = vmatpush1.bf16.msra.mxu1 %v1969_v4  ;;  %292 = vst.msk [vmem:[#allocation2 + $0x98] sm:$0xff] %vm272_vm3, %v2105_v23  ;;  %293 = vst.msk [vmem:[#allocation2 + $0xa0] sm:$0xff] %vm272_vm3, %v2105_v23  ;;  %v1990_v27 = vld [vmem:[%s2172_s28 + $0x114] ss:$8 sps:$4 sm:$0xff]   ;;  %v1993_v29 = vld [vmem:[%s2172_s28 + $0x110] ss:$8 sps:$4 sm:$0xff]  }
  0x15   : > { %989 = vmatprep.subr.bf16.mxu0 %v2103_v1  ;;  %1911 = vmatprep.subr.bf16.mxu1 %v2103_v1  ;;  %294 = vst.msk [vmem:[#allocation2 + $0xa8] sm:$0xff] %vm272_vm3, %v2105_v23  ;;  %295 = vst.msk [vmem:[#allocation2 + $0xb0] sm:$0xff] %vm272_vm3, %v2105_v23  ;;  %v1994_v30 = vld [vmem:[%s2172_s28 + $0x24] ss:$8 sps:$4 sm:$0xff]   ;;  %v1998_v32 = vld [vmem:[%s2172_s28 + $0x20] ss:$8 sps:$4 sm:$0xff]  }
  0x16   : > { %296 = vst.msk [vmem:[#allocation2 + $0xb8] sm:$0xff] %vm272_vm3, %v2105_v23  ;;  %297 = vst.msk [vmem:[#allocation2 + $0xc0] sm:$0xff] %vm272_vm3, %v2105_v23  ;;  %v1996_v31 = vld [vmem:[%s2172_s28 + $0x124] ss:$8 sps:$4 sm:$0xff]   ;;  %v1999_v33 = vld [vmem:[%s2172_s28 + $0x120] ss:$8 sps:$4 sm:$0xff]  }
  0x17   : > { %298 = vst.msk [vmem:[#allocation2 + $0xc8] sm:$0xff] %vm272_vm3, %v2105_v23  ;;  %299 = vst.msk [vmem:[#allocation2 + $0xd0] sm:$0xff] %vm272_vm3, %v2105_v23  ;;  %v2000_v34 = vld [vmem:[%s2172_s28 + $0x34] ss:$8 sps:$4 sm:$0xff]   ;;  %v2004_v36 = vld [vmem:[%s2172_s28 + $0x30] ss:$8 sps:$4 sm:$0xff]  }
  0x18   : > { %990 = vmatpush1.bf16.msra.mxu0 %v1970_v5  ;;  %1927 = vmatpush1.bf16.msra.mxu1 %v1970_v5  ;;  %300 = vst.msk [vmem:[#allocation2 + $0xd8] sm:$0xff] %vm272_vm3, %v2105_v23  ;;  %301 = vst.msk [vmem:[#allocation2 + $0xe0] sm:$0xff] %vm272_vm3, %v2105_v23  ;;  %v2002_v35 = vld [vmem:[%s2172_s28 + $0x134] ss:$8 sps:$4 sm:$0xff]   ;;  %v2005_v37 = vld [vmem:[%s2172_s28 + $0x130] ss:$8 sps:$4 sm:$0xff]  }
  0x19   : > { %991 = vmatprep.subr.bf16.mxu0 %v2103_v1  ;;  %1912 = vmatprep.subr.bf16.mxu1 %v2103_v1  ;;  %302 = vst.msk [vmem:[#allocation2 + $0xe8] sm:$0xff] %vm272_vm3, %v2105_v23  ;;  %303 = vst.msk [vmem:[#allocation2 + $0xf0] sm:$0xff] %vm272_vm3, %v2105_v23  ;;  %v2006_v38 = vld [vmem:[%s2172_s28 + $0x44] ss:$8 sps:$4 sm:$0xff]   ;;  %v2010_v40 = vld [vmem:[%s2172_s28 + $0x40] ss:$8 sps:$4 sm:$0xff]  }
  0x1a   : > { %304 = vst.msk [vmem:[#allocation2 + $0xf8] sm:$0xff] %vm272_vm3, %v2105_v23  ;;  %305 = vst.msk [vmem:[#allocation2 + $0x100] sm:$0xff] %vm272_vm3, %v2105_v23  ;;  %v2008_v39 = vld [vmem:[%s2172_s28 + $0x144] ss:$8 sps:$4 sm:$0xff]   ;;  %v2011_v41 = vld [vmem:[%s2172_s28 + $0x140] ss:$8 sps:$4 sm:$0xff]  }
  0x1b   : > { %306 = vst.msk [vmem:[#allocation2 + $0x108] sm:$0xff] %vm272_vm3, %v2105_v23  ;;  %307 = vst.msk [vmem:[#allocation2 + $0x110] sm:$0xff] %vm272_vm3, %v2105_v23  ;;  %v2012_v42 = vld [vmem:[%s2172_s28 + $0x54] ss:$8 sps:$4 sm:$0xff]   ;;  %v2016_v44 = vld [vmem:[%s2172_s28 + $0x50] ss:$8 sps:$4 sm:$0xff]  }
  0x1c   : > { %992 = vmatpush1.bf16.msra.mxu0 %v1971_v7  ;;  %1928 = vmatpush1.bf16.msra.mxu1 %v1971_v7  ;;  %308 = vst.msk [vmem:[#allocation2 + $0x118] sm:$0xff] %vm272_vm3, %v2105_v23  ;;  %309 = vst.msk [vmem:[#allocation2 + $0x120] sm:$0xff] %vm272_vm3, %v2105_v23  ;;  %v2014_v43 = vld [vmem:[%s2172_s28 + $0x154] ss:$8 sps:$4 sm:$0xff]   ;;  %v2017_v45 = vld [vmem:[%s2172_s28 + $0x150] ss:$8 sps:$4 sm:$0xff]  }
  0x1d   : > { %993 = vmatprep.subr.bf16.mxu0 %v2103_v1  ;;  %1913 = vmatprep.subr.bf16.mxu1 %v2103_v1  ;;  %310 = vst.msk [vmem:[#allocation2 + $0x128] sm:$0xff] %vm272_vm3, %v2105_v23  ;;  %311 = vst.msk [vmem:[#allocation2 + $0x130] sm:$0xff] %vm272_vm3, %v2105_v23  ;;  %v2018_v46 = vld [vmem:[%s2172_s28 + $0x64] ss:$8 sps:$4 sm:$0xff]   ;;  %v2022_v48 = vld [vmem:[%s2172_s28 + $0x60] ss:$8 sps:$4 sm:$0xff]  }
  0x1e   : > { %312 = vst.msk [vmem:[#allocation2 + $0x138] sm:$0xff] %vm272_vm3, %v2105_v23  ;;  %313 = vst.msk [vmem:[#allocation2 + $0x140] sm:$0xff] %vm272_vm3, %v2105_v23  ;;  %v2020_v47 = vld [vmem:[%s2172_s28 + $0x164] ss:$8 sps:$4 sm:$0xff]   ;;  %v2023_v49 = vld [vmem:[%s2172_s28 + $0x160] ss:$8 sps:$4 sm:$0xff]  }
  0x1f   : > { %314 = vst.msk [vmem:[#allocation2 + $0x148] sm:$0xff] %vm272_vm3, %v2105_v23  ;;  %315 = vst.msk [vmem:[#allocation2 + $0x150] sm:$0xff] %vm272_vm3, %v2105_v23  ;;  %v2024_v50 = vld [vmem:[%s2172_s28 + $0x74] ss:$8 sps:$4 sm:$0xff]   ;;  %v2028_v52 = vld [vmem:[%s2172_s28 + $0x70] ss:$8 sps:$4 sm:$0xff]  }
  0x20   : > { %994 = vmatpush1.bf16.msra.mxu0 %v1972_v9  ;;  %1929 = vmatpush1.bf16.msra.mxu1 %v1972_v9  ;;  %316 = vst.msk [vmem:[#allocation2 + $0x158] sm:$0xff] %vm272_vm3, %v2105_v23  ;;  %317 = vst.msk [vmem:[#allocation2 + $0x160] sm:$0xff] %vm272_vm3, %v2105_v23  ;;  %v2026_v51 = vld [vmem:[%s2172_s28 + $0x174] ss:$8 sps:$4 sm:$0xff]   ;;  %v2029_v53 = vld [vmem:[%s2172_s28 + $0x170] ss:$8 sps:$4 sm:$0xff]  }
  0x21   : > { %995 = vmatprep.subr.bf16.mxu0 %v2103_v1  ;;  %1914 = vmatprep.subr.bf16.mxu1 %v2103_v1  ;;  %318 = vst.msk [vmem:[#allocation2 + $0x168] sm:$0xff] %vm272_vm3, %v2105_v23  ;;  %319 = vst.msk [vmem:[#allocation2 + $0x170] sm:$0xff] %vm272_vm3, %v2105_v23  ;;  %v2030_v54 = vld [vmem:[%s2172_s28 + $0x84] ss:$8 sps:$4 sm:$0xff]   ;;  %v2034_v56 = vld [vmem:[%s2172_s28 + $0x80] ss:$8 sps:$4 sm:$0xff]  }
  0x22   : > { %320 = vst.msk [vmem:[#allocation2 + $0x178] sm:$0xff] %vm272_vm3, %v2105_v23  ;;  %321 = vst.msk [vmem:[#allocation2 + $0x180] sm:$0xff] %vm272_vm3, %v2105_v23  ;;  %v2032_v55 = vld [vmem:[%s2172_s28 + $0x184] ss:$8 sps:$4 sm:$0xff]   ;;  %v2035_v57 = vld [vmem:[%s2172_s28 + $0x180] ss:$8 sps:$4 sm:$0xff]  }
  0x23   : > { %322 = vst.msk [vmem:[#allocation2 + $0x188] sm:$0xff] %vm272_vm3, %v2105_v23  ;;  %323 = vst.msk [vmem:[#allocation2 + $0x190] sm:$0xff] %vm272_vm3, %v2105_v23  ;;  %v2036_v58 = vld [vmem:[%s2172_s28 + $0x94] ss:$8 sps:$4 sm:$0xff]   ;;  %v2040_v60 = vld [vmem:[%s2172_s28 + $0x90] ss:$8 sps:$4 sm:$0xff]  }
  0x24   : > { %996 = vmatpush1.bf16.msra.mxu0 %v1973_v10  ;;  %1930 = vmatpush1.bf16.msra.mxu1 %v1973_v10  ;;  %324 = vst.msk [vmem:[#allocation2 + $0x198] sm:$0xff] %vm272_vm3, %v2105_v23  ;;  %325 = vst.msk [vmem:[#allocation2 + $0x1a0] sm:$0xff] %vm272_vm3, %v2105_v23  ;;  %v2038_v59 = vld [vmem:[%s2172_s28 + $0x194] ss:$8 sps:$4 sm:$0xff]   ;;  %v2041_v61 = vld [vmem:[%s2172_s28 + $0x190] ss:$8 sps:$4 sm:$0xff]  }
  0x25   : > { %997 = vmatprep.subr.bf16.mxu0 %v2103_v1  ;;  %1915 = vmatprep.subr.bf16.mxu1 %v2103_v1  ;;  %326 = vst.msk [vmem:[#allocation2 + $0x1a8] sm:$0xff] %vm272_vm3, %v2105_v23  ;;  %327 = vst.msk [vmem:[#allocation2 + $0x1b0] sm:$0xff] %vm272_vm3, %v2105_v23  ;;  %v2042_v62 = vld [vmem:[%s2172_s28 + $0xa4] ss:$8 sps:$4 sm:$0xff]   ;;  %v2046_v0 = vld [vmem:[%s2172_s28 + $0xa0] ss:$8 sps:$4 sm:$0xff]  }
  0x26   : > { %328 = vst.msk [vmem:[#allocation2 + $0x1b8] sm:$0xff] %vm272_vm3, %v2105_v23  ;;  %329 = vst.msk [vmem:[#allocation2 + $0x1c0] sm:$0xff] %vm272_vm3, %v2105_v23  ;;  %v2044_v63 = vld [vmem:[%s2172_s28 + $0x1a4] ss:$8 sps:$4 sm:$0xff]   ;;  %v2048_v2 = vld [vmem:[%s2172_s28 + $0xb4] ss:$8 sps:$4 sm:$0xff]  }
  0x27   : > { %330 = vst.msk [vmem:[#allocation2 + $0x1c8] sm:$0xff] %vm272_vm3, %v2105_v23  ;;  %331 = vst.msk [vmem:[#allocation2 + $0x1d0] sm:$0xff] %vm272_vm3, %v2105_v23  ;;  %v2050_v3 = vld [vmem:[%s2172_s28 + $0x1b4] ss:$8 sps:$4 sm:$0xff]   ;;  %v2052_v4 = vld [vmem:[%s2172_s28 + $0xb0] ss:$8 sps:$4 sm:$0xff]  }
  0x28   : > { %998 = vmatpush1.bf16.msra.mxu0 %v1974_v11  ;;  %1931 = vmatpush1.bf16.msra.mxu1 %v1974_v11  ;;  %332 = vst.msk [vmem:[#allocation2 + $0x1d8] sm:$0xff] %vm272_vm3, %v2105_v23  ;;  %333 = vst.msk [vmem:[#allocation2 + $0x1e0] sm:$0xff] %vm272_vm3, %v2105_v23  ;;  %v2053_v5 = vld [vmem:[%s2172_s28 + $0x1b0] ss:$8 sps:$4 sm:$0xff]   ;;  %v2054_v6 = vld [vmem:[%s2172_s28 + $0xc4] ss:$8 sps:$4 sm:$0xff]  }
  0x29   : > { %999 = vmatprep.subr.bf16.mxu0 %v2103_v1  ;;  %1916 = vmatprep.subr.bf16.mxu1 %v2103_v1  ;;  %334 = vst.msk [vmem:[#allocation2 + $0x1e8] sm:$0xff] %vm272_vm3, %v2105_v23  ;;  %335 = vst.msk [vmem:[#allocation2 + $0x1f0] sm:$0xff] %vm272_vm3, %v2105_v23  ;;  %v2056_v7 = vld [vmem:[%s2172_s28 + $0x1c4] ss:$8 sps:$4 sm:$0xff]   ;;  %v2058_v8 = vld [vmem:[%s2172_s28 + $0xc0] ss:$8 sps:$4 sm:$0xff]  }
  0x2a   : > { %336 = vst.msk [vmem:[#allocation2 + $0x1f8] sm:$0xff] %vm272_vm3, %v2105_v23  ;;  %v2059_v9 = vld [vmem:[%s2172_s28 + $0x1c0] ss:$8 sps:$4 sm:$0xff]   ;;  %v2060_v10 = vld [vmem:[%s2172_s28 + $0xd4] ss:$8 sps:$4 sm:$0xff]  }
  0x2b   : > { %v2062_v11 = vld [vmem:[%s2172_s28 + $0x1d4] ss:$8 sps:$4 sm:$0xff]   ;;  %v2071_v17 = vld [vmem:[%s2172_s28 + $0x1e0] ss:$8 sps:$4 sm:$0xff]   ;;  %v2076_v20 = vld [vmem:[%s2172_s28 + $0xf0] ss:$8 sps:$4 sm:$0xff]  }
  0x2c   : > { %1000 = vmatpush1.bf16.msra.mxu0 %v1975_v12  ;;  %1932 = vmatpush1.bf16.msra.mxu1 %v1975_v12  ;;  %v2064_v12 = vld [vmem:[%s2172_s28 + $0xd0] ss:$8 sps:$4 sm:$0xff]   ;;  %v2072_v18 = vld [vmem:[%s2172_s28 + $0xf4] ss:$8 sps:$4 sm:$0xff]   ;;  %v369_v23 = vld [vmem:[#allocation2 + $0x100] sm:$0xff] }
  0x2d   : > { %1001 = vmatprep.subr.bf16.mxu0 %v2103_v1  ;;  %1917 = vmatprep.subr.bf16.mxu1 %v2103_v1  ;;  %v2077_v21 = vld [vmem:[%s2172_s28 + $0x1f0] ss:$8 sps:$4 sm:$0xff]  }
  0x30   : > { %1002 = vmatpush1.bf16.msra.mxu0 %v1976_v13  ;;  %1933 = vmatpush1.bf16.msra.mxu1 %v1976_v13  ;;  %v2065_v13 = vld [vmem:[%s2172_s28 + $0x1d0] ss:$8 sps:$4 sm:$0xff]  }
  0x31   : > { %1003 = vmatprep.subr.bf16.mxu0 %v2103_v1  ;;  %1918 = vmatprep.subr.bf16.mxu1 %v2103_v1 }
  0x34   : > { %1004 = vmatpush1.bf16.msra.mxu0 %v1977_v14  ;;  %1934 = vmatpush1.bf16.msra.mxu1 %v1977_v14  ;;  %v2066_v14 = vld [vmem:[%s2172_s28 + $0xe4] ss:$8 sps:$4 sm:$0xff]  }
  0x35   : > { %1005 = vmatprep.subr.bf16.mxu0 %v2103_v1  ;;  %1919 = vmatprep.subr.bf16.mxu1 %v2103_v1 }
  0x38   : > { %1006 = vmatpush1.bf16.msra.mxu0 %v1978_v15  ;;  %1935 = vmatpush1.bf16.msra.mxu1 %v1978_v15  ;;  %v2068_v15 = vld [vmem:[%s2172_s28 + $0x1e4] ss:$8 sps:$4 sm:$0xff]  }
  0x39   : > { %1007 = vmatprep.subr.bf16.mxu0 %v2103_v1  ;;  %1920 = vmatprep.subr.bf16.mxu1 %v2103_v1 }
  0x3c   : > { %1008 = vmatpush1.bf16.msra.mxu0 %v1979_v16  ;;  %1936 = vmatpush1.bf16.msra.mxu1 %v1979_v16  ;;  %v2070_v16 = vld [vmem:[%s2172_s28 + $0xe0] ss:$8 sps:$4 sm:$0xff]  }
  0x3d   : > { %1009 = vmatprep.subr.bf16.mxu0 %v2103_v1  ;;  %1921 = vmatprep.subr.bf16.mxu1 %v2103_v1 }
  0x40   : > { %1010 = vmatpush1.bf16.msra.mxu0 %v1980_v19  ;;  %1937 = vmatpush1.bf16.msra.mxu1 %v1980_v19  ;;  %v2074_v19 = vld [vmem:[%s2172_s28 + $0x1f4] ss:$8 sps:$4 sm:$0xff]  }
  0x41   : > { %1011 = vmatprep.subr.bf16.mxu0 %v2103_v1  ;;  %1922 = vmatprep.subr.bf16.mxu1 %v2103_v1  ;;  %v2047_v1 = vld [vmem:[%s2172_s28 + $0x1a0] ss:$8 sps:$4 sm:$0xff]  }
  0x44   : > { %1012 = vmatpush1.bf16.msra.mxu0 %v2236_v22  ;;  %1938 = vmatpush1.bf16.msra.mxu1 %v2236_v22  ;;  %v337_v22 = vld [vmem:[#allocation2] sm:$0xff] }
  0x47   : > { %1014 = vmatmul.mubr.bf16.vlgmr.msra.gmra.mrb[0].mxu0 %v1982_v24  ;;  %1142 = vmatmul.mubr.bf16.vlgmr.msra.gmra.mrb[0].mxu1 %v1985_v25 }
  0x48   : > { %1872 = vmatprep.mubr.msk.bf16.mxu0 %vm877_vm0, %v1988_v26  ;;  %1888 = vmatprep.mubr.msk.bf16.mxu1 %vm877_vm0, %v1990_v27  ;;  %v338_v26 = vld [vmem:[#allocation2 + $0x8] sm:$0xff] }
  0x49   : > { %v370_v27 = vld [vmem:[#allocation2 + $0x108] sm:$0xff] }
  0x4f   : > { %1022 = vmatmul.mubr.bf16.gmra.mrb[4].mxu0 %v1992_v28  ;;  %1150 = vmatmul.mubr.bf16.gmra.mrb[4].mxu1 %v1993_v29 }
  0x50   : > { %1873 = vmatprep.mubr.msk.bf16.mxu0 %vm877_vm0, %v1994_v30  ;;  %1889 = vmatprep.mubr.msk.bf16.mxu1 %vm877_vm0, %v1996_v31 }
  0x57   : > { %1030 = vmatmul.mubr.bf16.gmra.mrb[8].mxu0 %v1998_v32  ;;  %1158 = vmatmul.mubr.bf16.gmra.mrb[8].mxu1 %v1999_v33 }
  0x58   : > { %1874 = vmatprep.mubr.msk.bf16.mxu0 %vm877_vm0, %v2000_v34  ;;  %1890 = vmatprep.mubr.msk.bf16.mxu1 %vm877_vm0, %v2002_v35 }
  0x5f   : > { %1038 = vmatmul.mubr.bf16.gmra.mrb[12].mxu0 %v2004_v36  ;;  %1166 = vmatmul.mubr.bf16.gmra.mrb[12].mxu1 %v2005_v37 }
  0x60   : > { %1875 = vmatprep.mubr.msk.bf16.mxu0 %vm877_vm0, %v2006_v38  ;;  %1891 = vmatprep.mubr.msk.bf16.mxu1 %vm877_vm0, %v2008_v39  ;;  %v339_v38 = vld [vmem:[#allocation2 + $0x10] sm:$0xff] }
  0x61   : > { %v371_v39 = vld [vmem:[#allocation2 + $0x110] sm:$0xff] }
  0x67   : > { %1046 = vmatmul.mubr.bf16.gmra.mrb[16].mxu0 %v2010_v40  ;;  %1174 = vmatmul.mubr.bf16.gmra.mrb[16].mxu1 %v2011_v41  ;;  %v2469_v40 = vld [vmem:[%s2736_s2] ss:$0 sm:$0xff] }
  0x68   : > { %1876 = vmatprep.mubr.msk.bf16.mxu0 %vm877_vm0, %v2012_v42  ;;  %1892 = vmatprep.mubr.msk.bf16.mxu1 %vm877_vm0, %v2014_v43  ;;  %v340_v43 = vld [vmem:[#allocation2 + $0x18] sm:$0xff] }
  0x6f   : > { %1054 = vmatmul.mubr.bf16.gmra.mrb[20].mxu0 %v2016_v44  ;;  %1182 = vmatmul.mubr.bf16.gmra.mrb[20].mxu1 %v2017_v45  ;;  %v372_v44 = vld [vmem:[#allocation2 + $0x118] sm:$0xff] }
  0x70   : > { %1877 = vmatprep.mubr.msk.bf16.mxu0 %vm877_vm0, %v2018_v46  ;;  %1893 = vmatprep.mubr.msk.bf16.mxu1 %vm877_vm0, %v2020_v47 }
  0x77   : > { %1062 = vmatmul.mubr.bf16.gmra.mrb[24].mxu0 %v2022_v48  ;;  %1190 = vmatmul.mubr.bf16.gmra.mrb[24].mxu1 %v2023_v49 }
  0x78   : > { %1878 = vmatprep.mubr.msk.bf16.mxu0 %vm877_vm0, %v2024_v50  ;;  %1894 = vmatprep.mubr.msk.bf16.mxu1 %vm877_vm0, %v2026_v51 }
  0x7f   : > { %1070 = vmatmul.mubr.bf16.gmra.mrb[28].mxu0 %v2028_v52  ;;  %1198 = vmatmul.mubr.bf16.gmra.mrb[28].mxu1 %v2029_v53 }
  0x80   : > { %1879 = vmatprep.mubr.msk.bf16.mxu0 %vm877_vm0, %v2030_v54  ;;  %1895 = vmatprep.mubr.msk.bf16.mxu1 %vm877_vm0, %v2032_v55 }
  0x87   : > { %1078 = vmatmul.mubr.bf16.gmra.mrb[32].mxu0 %v2034_v56  ;;  %1206 = vmatmul.mubr.bf16.gmra.mrb[32].mxu1 %v2035_v57 }
  0x88   : > { %1880 = vmatprep.mubr.msk.bf16.mxu0 %vm877_vm0, %v2036_v58  ;;  %1896 = vmatprep.mubr.msk.bf16.mxu1 %vm877_vm0, %v2038_v59 }
  0x8f   : > { %1086 = vmatmul.mubr.bf16.gmra.mrb[36].mxu0 %v2040_v60  ;;  %1214 = vmatmul.mubr.bf16.gmra.mrb[36].mxu1 %v2041_v61 }
  0x90   : > { %1881 = vmatprep.mubr.msk.bf16.mxu0 %vm877_vm0, %v2042_v62  ;;  %1897 = vmatprep.mubr.msk.bf16.mxu1 %vm877_vm0, %v2044_v63 }
  0x97   : > { %1094 = vmatmul.mubr.bf16.gmra.mrb[40].mxu0 %v2046_v0  ;;  %1222 = vmatmul.mubr.bf16.gmra.mrb[40].mxu1 %v2047_v1  ;;  %v341_v1 = vld [vmem:[#allocation2 + $0x20] sm:$0xff] }
  0x98   : > { %1882 = vmatprep.mubr.msk.bf16.mxu0 %vm877_vm0, %v2048_v2  ;;  %1898 = vmatprep.mubr.msk.bf16.mxu1 %vm877_vm0, %v2050_v3  ;;  %v373_v2 = vld [vmem:[#allocation2 + $0x120] sm:$0xff] }
  0x9f   : > { %1102 = vmatmul.mubr.bf16.gmra.mrb[44].mxu0 %v2052_v4  ;;  %1230 = vmatmul.mubr.bf16.gmra.mrb[44].mxu1 %v2053_v5 }
  0xa0   : > { %1883 = vmatprep.mubr.msk.bf16.mxu0 %vm877_vm0, %v2054_v6  ;;  %1899 = vmatprep.mubr.msk.bf16.mxu1 %vm877_vm0, %v2056_v7  ;;  %v342_v7 = vld [vmem:[#allocation2 + $0x28] sm:$0xff] }
  0xa7   : > { %1110 = vmatmul.mubr.bf16.gmra.mrb[48].mxu0 %v2058_v8  ;;  %1238 = vmatmul.mubr.bf16.gmra.mrb[48].mxu1 %v2059_v9  ;;  %v374_v8 = vld [vmem:[#allocation2 + $0x128] sm:$0xff] }
  0xa8   : > { %1884 = vmatprep.mubr.msk.bf16.mxu0 %vm877_vm0, %v2060_v10  ;;  %1900 = vmatprep.mubr.msk.bf16.mxu1 %vm877_vm0, %v2062_v11 }
  0xaf   : > { %1118 = vmatmul.mubr.bf16.gmra.mrb[52].mxu0 %v2064_v12  ;;  %1246 = vmatmul.mubr.bf16.gmra.mrb[52].mxu1 %v2065_v13 }
  0xb0   : > { %1885 = vmatprep.mubr.msk.bf16.mxu0 %vm877_vm0, %v2066_v14  ;;  %1901 = vmatprep.mubr.msk.bf16.mxu1 %vm877_vm0, %v2068_v15 }
  0xb7   : > { %1126 = vmatmul.mubr.bf16.gmra.mrb[56].mxu0 %v2070_v16  ;;  %1254 = vmatmul.mubr.bf16.gmra.mrb[56].mxu1 %v2071_v17 }
  0xb8   : > { %1886 = vmatprep.mubr.msk.bf16.mxu0 %vm877_vm0, %v2072_v18  ;;  %1902 = vmatprep.mubr.msk.bf16.mxu1 %vm877_vm0, %v2074_v19 }
  0xbf   : > { %1134 = vmatmul.mubr.bf16.gmra.mrb[60].mxu0 %v2076_v20  ;;  %1262 = vmatmul.mubr.bf16.gmra.mrb[60].mxu1 %v2077_v21 }
 0x11a   : > { %v1015_v24 = vpop.f32.mrb[0].mxu0  ;;  %v1143_v25 = vpop.f32.mrb[0].mxu1 }
 0x11b   : > { %v1270_v28 = vadd.f32 %v1015_v24, %v337_v22  ;;  %v1302_v29 = vadd.f32 %v1143_v25, %v369_v23  ;;  %v1017_v30 = vpop.f32.mrb[1].mxu0  ;;  %v1145_v31 = vpop.f32.mrb[1].mxu1 }
 0x11c   : > { %v1018_v32 = vpop.f32.mrb[2].mxu0  ;;  %v1146_v33 = vpop.f32.mrb[2].mxu1  ;;  %v375_v30 = vld [vmem:[#allocation2 + $0x130] sm:$0xff] }
 0x11d   : > { %1335 = vst.msk [vmem:[#allocation2] sm:$0xff] %vm272_vm3, %v1270_v28  ;;  %1367 = vst.msk [vmem:[#allocation2 + $0x100] sm:$0xff] %vm272_vm3, %v1302_v29  ;;  %v1271_v34 = vadd.f32 %v1018_v32, %v338_v26  ;;  %v1303_v35 = vadd.f32 %v1146_v33, %v370_v27  ;;  %v1020_v36 = vpop.f32.mrb[3].mxu0  ;;  %v1148_v37 = vpop.f32.mrb[3].mxu1  ;;  %v343_v29 = vld [vmem:[#allocation2 + $0x30] sm:$0xff] }
 0x11e   : > { %v376_v36 = vld [vmem:[#allocation2 + $0x138] sm:$0xff] }
 0x11f   : > { %1336 = vst.msk [vmem:[#allocation2 + $0x8] sm:$0xff] %vm272_vm3, %v1271_v34  ;;  %1368 = vst.msk [vmem:[#allocation2 + $0x108] sm:$0xff] %vm272_vm3, %v1303_v35  ;;  %v344_v35 = vld [vmem:[#allocation2 + $0x38] sm:$0xff] }
 0x122   : > { %v1023_v41 = vpop.f32.mrb[4].mxu0  ;;  %v1151_v42 = vpop.f32.mrb[4].mxu1 }
 0x123   : > { %v1272_v45 = vadd.f32 %v1023_v41, %v339_v38  ;;  %v1304_v46 = vadd.f32 %v1151_v42, %v371_v39  ;;  %v1025_v47 = vpop.f32.mrb[5].mxu0  ;;  %v1153_v48 = vpop.f32.mrb[5].mxu1 }
 0x124   : > { %v1402_v49 = vld [vmem:[#allocation2] sm:$0xff]  ;;  %v1026_v51 = vpop.f32.mrb[6].mxu0  ;;  %v1154_v52 = vpop.f32.mrb[6].mxu1 }
 0x125   : > { %v1434_v50 = vld [vmem:[#allocation2 + $0x100] sm:$0xff]  ;;  %v1473_v53 = vadd.f32 %v2469_v40, %v1402_v49  ;;  %1337 = vst.msk [vmem:[#allocation2 + $0x10] sm:$0xff] %vm272_vm3, %v1272_v45  ;;  %1369 = vst.msk [vmem:[#allocation2 + $0x110] sm:$0xff] %vm272_vm3, %v1304_v46  ;;  %v1273_v55 = vadd.f32 %v1026_v51, %v340_v43  ;;  %v1305_v56 = vadd.f32 %v1154_v52, %v372_v44  ;;  %v1028_v57 = vpop.f32.mrb[7].mxu0  ;;  %v1156_v58 = vpop.f32.mrb[7].mxu1 }
 0x126   : > { %v1505_v54 = vadd.f32 %v2469_v40, %v1434_v50  ;;  %v1403_v59 = vld [vmem:[#allocation2 + $0x8] sm:$0xff]  ;;  %v345_v58 = vld [vmem:[#allocation2 + $0x40] sm:$0xff] }
 0x127   : > { %v1435_v60 = vld [vmem:[#allocation2 + $0x108] sm:$0xff]  ;;  %v1537_v61 = vmax.f32 %v1473_v53, 0.0  ;;  %v1474_v63 = vadd.f32 %v2469_v40, %v1403_v59  ;;  %1338 = vst.msk [vmem:[#allocation2 + $0x18] sm:$0xff] %vm272_vm3, %v1273_v55  ;;  %1370 = vst.msk [vmem:[#allocation2 + $0x118] sm:$0xff] %vm272_vm3, %v1305_v56  ;;  %v377_v59 = vld [vmem:[#allocation2 + $0x140] sm:$0xff] }
 0x128   : > { %v1569_v62 = vmax.f32 %v1505_v54, 0.0  ;;  %v1506_v0 = vadd.f32 %v2469_v40, %v1435_v60 }
 0x129   : > { %1601 = vst.msk [vmem:[%s2480_s8] sm:$0xff] %vm272_vm3, %v1537_v61  ;;  %v1538_v3 = vmax.f32 %v1474_v63, 0.0 }
 0x12a   : > { %1633 = vst.msk [vmem:[%s2480_s8 + $0x100] sm:$0xff] %vm272_vm3, %v1569_v62  ;;  %v1570_v4 = vmax.f32 %v1506_v0, 0.0  ;;  %v1031_v5 = vpop.f32.mrb[8].mxu0  ;;  %v1159_v6 = vpop.f32.mrb[8].mxu1  ;;  %v346_v0 = vld [vmem:[#allocation2 + $0x48] sm:$0xff] }
 0x12b   : > { %1602 = vst.msk [vmem:[%s2480_s8 + $0x8] sm:$0xff] %vm272_vm3, %v1538_v3  ;;  %v1274_v9 = vadd.f32 %v1031_v5, %v341_v1  ;;  %v1306_v10 = vadd.f32 %v1159_v6, %v373_v2  ;;  %v1033_v11 = vpop.f32.mrb[9].mxu0  ;;  %v1161_v12 = vpop.f32.mrb[9].mxu1  ;;  %v378_v1 = vld [vmem:[#allocation2 + $0x148] sm:$0xff] }
 0x12c   : > { %1634 = vst.msk [vmem:[%s2480_s8 + $0x108] sm:$0xff] %vm272_vm3, %v1570_v4  ;;  %v1404_v13 = vld [vmem:[#allocation2 + $0x10] sm:$0xff]  ;;  %v1034_v15 = vpop.f32.mrb[10].mxu0  ;;  %v1162_v16 = vpop.f32.mrb[10].mxu1 }
 0x12d   : > { %v1436_v14 = vld [vmem:[#allocation2 + $0x110] sm:$0xff]  ;;  %v1475_v17 = vadd.f32 %v2469_v40, %v1404_v13  ;;  %1339 = vst.msk [vmem:[#allocation2 + $0x20] sm:$0xff] %vm272_vm3, %v1274_v9  ;;  %1371 = vst.msk [vmem:[#allocation2 + $0x120] sm:$0xff] %vm272_vm3, %v1306_v10  ;;  %v1275_v19 = vadd.f32 %v1034_v15, %v342_v7  ;;  %v1307_v20 = vadd.f32 %v1162_v16, %v374_v8  ;;  %v1036_v21 = vpop.f32.mrb[11].mxu0  ;;  %v1164_v22 = vpop.f32.mrb[11].mxu1 }
 0x12e   : > { %v1507_v18 = vadd.f32 %v2469_v40, %v1436_v14  ;;  %v1405_v23 = vld [vmem:[#allocation2 + $0x18] sm:$0xff]  ;;  %v347_v22 = vld [vmem:[#allocation2 + $0x50] sm:$0xff] }
 0x12f   : > { %v1437_v24 = vld [vmem:[#allocation2 + $0x118] sm:$0xff]  ;;  %v1539_v25 = vmax.f32 %v1475_v17, 0.0  ;;  %v1476_v27 = vadd.f32 %v2469_v40, %v1405_v23  ;;  %1340 = vst.msk [vmem:[#allocation2 + $0x28] sm:$0xff] %vm272_vm3, %v1275_v19  ;;  %1372 = vst.msk [vmem:[#allocation2 + $0x128] sm:$0xff] %vm272_vm3, %v1307_v20  ;;  %v379_v23 = vld [vmem:[#allocation2 + $0x150] sm:$0xff] }
 0x130   : > { %v1571_v26 = vmax.f32 %v1507_v18, 0.0  ;;  %v1508_v28 = vadd.f32 %v2469_v40, %v1437_v24 }
 0x131   : > { %1603 = vst.msk [vmem:[%s2480_s8 + $0x10] sm:$0xff] %vm272_vm3, %v1539_v25  ;;  %v1540_v31 = vmax.f32 %v1476_v27, 0.0 }
 0x132   : > { %1635 = vst.msk [vmem:[%s2480_s8 + $0x110] sm:$0xff] %vm272_vm3, %v1571_v26  ;;  %v1572_v32 = vmax.f32 %v1508_v28, 0.0  ;;  %v1039_v33 = vpop.f32.mrb[12].mxu0  ;;  %v1167_v34 = vpop.f32.mrb[12].mxu1  ;;  %v348_v28 = vld [vmem:[#allocation2 + $0x58] sm:$0xff] }
 0x133   : > { %1604 = vst.msk [vmem:[%s2480_s8 + $0x18] sm:$0xff] %vm272_vm3, %v1540_v31  ;;  %v1276_v37 = vadd.f32 %v1039_v33, %v343_v29  ;;  %v1308_v38 = vadd.f32 %v1167_v34, %v375_v30  ;;  %v1041_v39 = vpop.f32.mrb[13].mxu0  ;;  %v1169_v41 = vpop.f32.mrb[13].mxu1  ;;  %v380_v29 = vld [vmem:[#allocation2 + $0x158] sm:$0xff] }
 0x134   : > { %1636 = vst.msk [vmem:[%s2480_s8 + $0x118] sm:$0xff] %vm272_vm3, %v1572_v32  ;;  %v1406_v42 = vld [vmem:[#allocation2 + $0x20] sm:$0xff]  ;;  %v1042_v44 = vpop.f32.mrb[14].mxu0  ;;  %v1170_v45 = vpop.f32.mrb[14].mxu1 }
 0x135   : > { %v1438_v43 = vld [vmem:[#allocation2 + $0x120] sm:$0xff]  ;;  %v1477_v46 = vadd.f32 %v2469_v40, %v1406_v42  ;;  %1341 = vst.msk [vmem:[#allocation2 + $0x30] sm:$0xff] %vm272_vm3, %v1276_v37  ;;  %1373 = vst.msk [vmem:[#allocation2 + $0x130] sm:$0xff] %vm272_vm3, %v1308_v38  ;;  %v1277_v48 = vadd.f32 %v1042_v44, %v344_v35  ;;  %v1309_v49 = vadd.f32 %v1170_v45, %v376_v36  ;;  %v1044_v50 = vpop.f32.mrb[15].mxu0  ;;  %v1172_v51 = vpop.f32.mrb[15].mxu1 }
 0x136   : > { %v1509_v47 = vadd.f32 %v2469_v40, %v1438_v43  ;;  %v1407_v52 = vld [vmem:[#allocation2 + $0x28] sm:$0xff]  ;;  %v349_v51 = vld [vmem:[#allocation2 + $0x60] sm:$0xff] }
 0x137   : > { %v1439_v53 = vld [vmem:[#allocation2 + $0x128] sm:$0xff]  ;;  %v1541_v54 = vmax.f32 %v1477_v46, 0.0  ;;  %v1478_v56 = vadd.f32 %v2469_v40, %v1407_v52  ;;  %1342 = vst.msk [vmem:[#allocation2 + $0x38] sm:$0xff] %vm272_vm3, %v1277_v48  ;;  %1374 = vst.msk [vmem:[#allocation2 + $0x138] sm:$0xff] %vm272_vm3, %v1309_v49  ;;  %v381_v52 = vld [vmem:[#allocation2 + $0x160] sm:$0xff] }
 0x138   : > { %v1573_v55 = vmax.f32 %v1509_v47, 0.0  ;;  %v1510_v57 = vadd.f32 %v2469_v40, %v1439_v53 }
 0x139   : > { %1605 = vst.msk [vmem:[%s2480_s8 + $0x20] sm:$0xff] %vm272_vm3, %v1541_v54  ;;  %v1542_v60 = vmax.f32 %v1478_v56, 0.0 }
 0x13a   : > { %1637 = vst.msk [vmem:[%s2480_s8 + $0x120] sm:$0xff] %vm272_vm3, %v1573_v55  ;;  %v1574_v61 = vmax.f32 %v1510_v57, 0.0  ;;  %v1047_v62 = vpop.f32.mrb[16].mxu0  ;;  %v1175_v63 = vpop.f32.mrb[16].mxu1  ;;  %v350_v57 = vld [vmem:[#allocation2 + $0x68] sm:$0xff] }
 0x13b   : > { %1606 = vst.msk [vmem:[%s2480_s8 + $0x28] sm:$0xff] %vm272_vm3, %v1542_v60  ;;  %v1278_v2 = vadd.f32 %v1047_v62, %v345_v58  ;;  %v1310_v3 = vadd.f32 %v1175_v63, %v377_v59  ;;  %v1049_v4 = vpop.f32.mrb[17].mxu0  ;;  %v1177_v5 = vpop.f32.mrb[17].mxu1  ;;  %v382_v58 = vld [vmem:[#allocation2 + $0x168] sm:$0xff] }
 0x13c   : > { %1638 = vst.msk [vmem:[%s2480_s8 + $0x128] sm:$0xff] %vm272_vm3, %v1574_v61  ;;  %v1408_v6 = vld [vmem:[#allocation2 + $0x30] sm:$0xff]  ;;  %v1050_v8 = vpop.f32.mrb[18].mxu0  ;;  %v1178_v9 = vpop.f32.mrb[18].mxu1 }
 0x13d   : > { %v1440_v7 = vld [vmem:[#allocation2 + $0x130] sm:$0xff]  ;;  %v1479_v10 = vadd.f32 %v2469_v40, %v1408_v6  ;;  %1343 = vst.msk [vmem:[#allocation2 + $0x40] sm:$0xff] %vm272_vm3, %v1278_v2  ;;  %1375 = vst.msk [vmem:[#allocation2 + $0x140] sm:$0xff] %vm272_vm3, %v1310_v3  ;;  %v1279_v12 = vadd.f32 %v1050_v8, %v346_v0  ;;  %v1311_v13 = vadd.f32 %v1178_v9, %v378_v1  ;;  %v1052_v14 = vpop.f32.mrb[19].mxu0  ;;  %v1180_v15 = vpop.f32.mrb[19].mxu1 }
 0x13e   : > { %v1511_v11 = vadd.f32 %v2469_v40, %v1440_v7  ;;  %v1409_v16 = vld [vmem:[#allocation2 + $0x38] sm:$0xff]  ;;  %v351_v15 = vld [vmem:[#allocation2 + $0x70] sm:$0xff] }
 0x13f   : > { %v1441_v17 = vld [vmem:[#allocation2 + $0x138] sm:$0xff]  ;;  %v1543_v18 = vmax.f32 %v1479_v10, 0.0  ;;  %v1480_v20 = vadd.f32 %v2469_v40, %v1409_v16  ;;  %1344 = vst.msk [vmem:[#allocation2 + $0x48] sm:$0xff] %vm272_vm3, %v1279_v12  ;;  %1376 = vst.msk [vmem:[#allocation2 + $0x148] sm:$0xff] %vm272_vm3, %v1311_v13  ;;  %v383_v16 = vld [vmem:[#allocation2 + $0x170] sm:$0xff] }
 0x140   : > { %v1575_v19 = vmax.f32 %v1511_v11, 0.0  ;;  %v1512_v21 = vadd.f32 %v2469_v40, %v1441_v17 }
 0x141   : > { %1607 = vst.msk [vmem:[%s2480_s8 + $0x30] sm:$0xff] %vm272_vm3, %v1543_v18  ;;  %v1544_v24 = vmax.f32 %v1480_v20, 0.0 }
 0x142   : > { %1639 = vst.msk [vmem:[%s2480_s8 + $0x130] sm:$0xff] %vm272_vm3, %v1575_v19  ;;  %v1576_v25 = vmax.f32 %v1512_v21, 0.0  ;;  %v1055_v26 = vpop.f32.mrb[20].mxu0  ;;  %v1183_v27 = vpop.f32.mrb[20].mxu1  ;;  %v352_v21 = vld [vmem:[#allocation2 + $0x78] sm:$0xff] }
 0x143   : > { %1608 = vst.msk [vmem:[%s2480_s8 + $0x38] sm:$0xff] %vm272_vm3, %v1544_v24  ;;  %v1280_v30 = vadd.f32 %v1055_v26, %v347_v22  ;;  %v1312_v31 = vadd.f32 %v1183_v27, %v379_v23  ;;  %v1057_v32 = vpop.f32.mrb[21].mxu0  ;;  %v1185_v33 = vpop.f32.mrb[21].mxu1  ;;  %v384_v22 = vld [vmem:[#allocation2 + $0x178] sm:$0xff] }
 0x144   : > { %1640 = vst.msk [vmem:[%s2480_s8 + $0x138] sm:$0xff] %vm272_vm3, %v1576_v25  ;;  %v1410_v34 = vld [vmem:[#allocation2 + $0x40] sm:$0xff]  ;;  %v1058_v36 = vpop.f32.mrb[22].mxu0  ;;  %v1186_v37 = vpop.f32.mrb[22].mxu1 }
 0x145   : > { %v1442_v35 = vld [vmem:[#allocation2 + $0x140] sm:$0xff]  ;;  %v1481_v38 = vadd.f32 %v2469_v40, %v1410_v34  ;;  %1345 = vst.msk [vmem:[#allocation2 + $0x50] sm:$0xff] %vm272_vm3, %v1280_v30  ;;  %1377 = vst.msk [vmem:[#allocation2 + $0x150] sm:$0xff] %vm272_vm3, %v1312_v31  ;;  %v1281_v41 = vadd.f32 %v1058_v36, %v348_v28  ;;  %v1313_v42 = vadd.f32 %v1186_v37, %v380_v29  ;;  %v1060_v43 = vpop.f32.mrb[23].mxu0  ;;  %v1188_v44 = vpop.f32.mrb[23].mxu1 }
 0x146   : > { %v1513_v39 = vadd.f32 %v2469_v40, %v1442_v35  ;;  %v1411_v45 = vld [vmem:[#allocation2 + $0x48] sm:$0xff]  ;;  %v353_v44 = vld [vmem:[#allocation2 + $0x80] sm:$0xff] }
 0x147   : > { %v1443_v46 = vld [vmem:[#allocation2 + $0x148] sm:$0xff]  ;;  %v1545_v47 = vmax.f32 %v1481_v38, 0.0  ;;  %v1482_v49 = vadd.f32 %v2469_v40, %v1411_v45  ;;  %1346 = vst.msk [vmem:[#allocation2 + $0x58] sm:$0xff] %vm272_vm3, %v1281_v41  ;;  %1378 = vst.msk [vmem:[#allocation2 + $0x158] sm:$0xff] %vm272_vm3, %v1313_v42  ;;  %v385_v45 = vld [vmem:[#allocation2 + $0x180] sm:$0xff] }
 0x148   : > { %v1577_v48 = vmax.f32 %v1513_v39, 0.0  ;;  %v1514_v50 = vadd.f32 %v2469_v40, %v1443_v46 }
 0x149   : > { %1609 = vst.msk [vmem:[%s2480_s8 + $0x40] sm:$0xff] %vm272_vm3, %v1545_v47  ;;  %v1546_v53 = vmax.f32 %v1482_v49, 0.0 }
 0x14a   : > { %1641 = vst.msk [vmem:[%s2480_s8 + $0x140] sm:$0xff] %vm272_vm3, %v1577_v48  ;;  %v1578_v54 = vmax.f32 %v1514_v50, 0.0  ;;  %v1063_v55 = vpop.f32.mrb[24].mxu0  ;;  %v1191_v56 = vpop.f32.mrb[24].mxu1  ;;  %v354_v50 = vld [vmem:[#allocation2 + $0x88] sm:$0xff] }
 0x14b   : > { %1610 = vst.msk [vmem:[%s2480_s8 + $0x48] sm:$0xff] %vm272_vm3, %v1546_v53  ;;  %v1282_v59 = vadd.f32 %v1063_v55, %v349_v51  ;;  %v1314_v60 = vadd.f32 %v1191_v56, %v381_v52  ;;  %v1065_v61 = vpop.f32.mrb[25].mxu0  ;;  %v1193_v62 = vpop.f32.mrb[25].mxu1  ;;  %v386_v51 = vld [vmem:[#allocation2 + $0x188] sm:$0xff] }
 0x14c   : > { %1642 = vst.msk [vmem:[%s2480_s8 + $0x148] sm:$0xff] %vm272_vm3, %v1578_v54  ;;  %v1412_v63 = vld [vmem:[#allocation2 + $0x50] sm:$0xff]  ;;  %v1066_v1 = vpop.f32.mrb[26].mxu0  ;;  %v1194_v2 = vpop.f32.mrb[26].mxu1 }
 0x14d   : > { %v1444_v0 = vld [vmem:[#allocation2 + $0x150] sm:$0xff]  ;;  %v1483_v3 = vadd.f32 %v2469_v40, %v1412_v63  ;;  %1347 = vst.msk [vmem:[#allocation2 + $0x60] sm:$0xff] %vm272_vm3, %v1282_v59  ;;  %1379 = vst.msk [vmem:[#allocation2 + $0x160] sm:$0xff] %vm272_vm3, %v1314_v60  ;;  %v1283_v5 = vadd.f32 %v1066_v1, %v350_v57  ;;  %v1315_v6 = vadd.f32 %v1194_v2, %v382_v58  ;;  %v1068_v7 = vpop.f32.mrb[27].mxu0  ;;  %v1196_v8 = vpop.f32.mrb[27].mxu1 }
 0x14e   : > { %v1515_v4 = vadd.f32 %v2469_v40, %v1444_v0  ;;  %v1413_v9 = vld [vmem:[#allocation2 + $0x58] sm:$0xff]  ;;  %v355_v8 = vld [vmem:[#allocation2 + $0x90] sm:$0xff] }
 0x14f   : > { %v1445_v10 = vld [vmem:[#allocation2 + $0x158] sm:$0xff]  ;;  %v1547_v11 = vmax.f32 %v1483_v3, 0.0  ;;  %v1484_v13 = vadd.f32 %v2469_v40, %v1413_v9  ;;  %1348 = vst.msk [vmem:[#allocation2 + $0x68] sm:$0xff] %vm272_vm3, %v1283_v5  ;;  %1380 = vst.msk [vmem:[#allocation2 + $0x168] sm:$0xff] %vm272_vm3, %v1315_v6  ;;  %v387_v9 = vld [vmem:[#allocation2 + $0x190] sm:$0xff] }
 0x150   : > { %v1579_v12 = vmax.f32 %v1515_v4, 0.0  ;;  %v1516_v14 = vadd.f32 %v2469_v40, %v1445_v10 }
 0x151   : > { %1611 = vst.msk [vmem:[%s2480_s8 + $0x50] sm:$0xff] %vm272_vm3, %v1547_v11  ;;  %v1548_v17 = vmax.f32 %v1484_v13, 0.0 }
 0x152   : > { %1643 = vst.msk [vmem:[%s2480_s8 + $0x150] sm:$0xff] %vm272_vm3, %v1579_v12  ;;  %v1580_v18 = vmax.f32 %v1516_v14, 0.0  ;;  %v1071_v19 = vpop.f32.mrb[28].mxu0  ;;  %v1199_v20 = vpop.f32.mrb[28].mxu1  ;;  %v356_v14 = vld [vmem:[#allocation2 + $0x98] sm:$0xff] }
 0x153   : > { %1612 = vst.msk [vmem:[%s2480_s8 + $0x58] sm:$0xff] %vm272_vm3, %v1548_v17  ;;  %v1284_v23 = vadd.f32 %v1071_v19, %v351_v15  ;;  %v1316_v24 = vadd.f32 %v1199_v20, %v383_v16  ;;  %v1073_v25 = vpop.f32.mrb[29].mxu0  ;;  %v1201_v26 = vpop.f32.mrb[29].mxu1  ;;  %v388_v15 = vld [vmem:[#allocation2 + $0x198] sm:$0xff] }
 0x154   : > { %1644 = vst.msk [vmem:[%s2480_s8 + $0x158] sm:$0xff] %vm272_vm3, %v1580_v18  ;;  %v1414_v27 = vld [vmem:[#allocation2 + $0x60] sm:$0xff]  ;;  %v1074_v29 = vpop.f32.mrb[30].mxu0  ;;  %v1202_v30 = vpop.f32.mrb[30].mxu1 }
 0x155   : > { %v1446_v28 = vld [vmem:[#allocation2 + $0x160] sm:$0xff]  ;;  %v1485_v31 = vadd.f32 %v2469_v40, %v1414_v27  ;;  %1349 = vst.msk [vmem:[#allocation2 + $0x70] sm:$0xff] %vm272_vm3, %v1284_v23  ;;  %1381 = vst.msk [vmem:[#allocation2 + $0x170] sm:$0xff] %vm272_vm3, %v1316_v24  ;;  %v1285_v33 = vadd.f32 %v1074_v29, %v352_v21  ;;  %v1317_v34 = vadd.f32 %v1202_v30, %v384_v22  ;;  %v1076_v35 = vpop.f32.mrb[31].mxu0  ;;  %v1204_v36 = vpop.f32.mrb[31].mxu1 }
 0x156   : > { %v1517_v32 = vadd.f32 %v2469_v40, %v1446_v28  ;;  %v1415_v37 = vld [vmem:[#allocation2 + $0x68] sm:$0xff]  ;;  %v357_v36 = vld [vmem:[#allocation2 + $0xa0] sm:$0xff] }
 0x157   : > { %v1447_v38 = vld [vmem:[#allocation2 + $0x168] sm:$0xff]  ;;  %v1549_v39 = vmax.f32 %v1485_v31, 0.0  ;;  %v1486_v42 = vadd.f32 %v2469_v40, %v1415_v37  ;;  %1350 = vst.msk [vmem:[#allocation2 + $0x78] sm:$0xff] %vm272_vm3, %v1285_v33  ;;  %1382 = vst.msk [vmem:[#allocation2 + $0x178] sm:$0xff] %vm272_vm3, %v1317_v34  ;;  %v389_v37 = vld [vmem:[#allocation2 + $0x1a0] sm:$0xff] }
 0x158   : > { %v1581_v41 = vmax.f32 %v1517_v32, 0.0  ;;  %v1518_v43 = vadd.f32 %v2469_v40, %v1447_v38 }
 0x159   : > { %1613 = vst.msk [vmem:[%s2480_s8 + $0x60] sm:$0xff] %vm272_vm3, %v1549_v39  ;;  %v1550_v46 = vmax.f32 %v1486_v42, 0.0 }
 0x15a   : > { %1645 = vst.msk [vmem:[%s2480_s8 + $0x160] sm:$0xff] %vm272_vm3, %v1581_v41  ;;  %v1582_v47 = vmax.f32 %v1518_v43, 0.0  ;;  %v1079_v48 = vpop.f32.mrb[32].mxu0  ;;  %v1207_v49 = vpop.f32.mrb[32].mxu1  ;;  %v358_v43 = vld [vmem:[#allocation2 + $0xa8] sm:$0xff] }
 0x15b   : > { %1614 = vst.msk [vmem:[%s2480_s8 + $0x68] sm:$0xff] %vm272_vm3, %v1550_v46  ;;  %v1286_v52 = vadd.f32 %v1079_v48, %v353_v44  ;;  %v1318_v53 = vadd.f32 %v1207_v49, %v385_v45  ;;  %v1081_v54 = vpop.f32.mrb[33].mxu0  ;;  %v1209_v55 = vpop.f32.mrb[33].mxu1  ;;  %v390_v44 = vld [vmem:[#allocation2 + $0x1a8] sm:$0xff] }
 0x15c   : > { %1646 = vst.msk [vmem:[%s2480_s8 + $0x168] sm:$0xff] %vm272_vm3, %v1582_v47  ;;  %v1416_v56 = vld [vmem:[#allocation2 + $0x70] sm:$0xff]  ;;  %v1082_v58 = vpop.f32.mrb[34].mxu0  ;;  %v1210_v59 = vpop.f32.mrb[34].mxu1 }
 0x15d   : > { %v1448_v57 = vld [vmem:[#allocation2 + $0x170] sm:$0xff]  ;;  %v1487_v60 = vadd.f32 %v2469_v40, %v1416_v56  ;;  %1351 = vst.msk [vmem:[#allocation2 + $0x80] sm:$0xff] %vm272_vm3, %v1286_v52  ;;  %1383 = vst.msk [vmem:[#allocation2 + $0x180] sm:$0xff] %vm272_vm3, %v1318_v53  ;;  %v1287_v62 = vadd.f32 %v1082_v58, %v354_v50  ;;  %v1319_v63 = vadd.f32 %v1210_v59, %v386_v51  ;;  %v1084_v0 = vpop.f32.mrb[35].mxu0  ;;  %v1212_v1 = vpop.f32.mrb[35].mxu1 }
 0x15e   : > { %v1519_v61 = vadd.f32 %v2469_v40, %v1448_v57  ;;  %v1417_v2 = vld [vmem:[#allocation2 + $0x78] sm:$0xff]  ;;  %v359_v1 = vld [vmem:[#allocation2 + $0xb0] sm:$0xff] }
 0x15f   : > { %v1449_v3 = vld [vmem:[#allocation2 + $0x178] sm:$0xff]  ;;  %v1551_v4 = vmax.f32 %v1487_v60, 0.0  ;;  %v1488_v6 = vadd.f32 %v2469_v40, %v1417_v2  ;;  %1352 = vst.msk [vmem:[#allocation2 + $0x88] sm:$0xff] %vm272_vm3, %v1287_v62  ;;  %1384 = vst.msk [vmem:[#allocation2 + $0x188] sm:$0xff] %vm272_vm3, %v1319_v63  ;;  %v391_v2 = vld [vmem:[#allocation2 + $0x1b0] sm:$0xff] }
 0x160   : > { %v1583_v5 = vmax.f32 %v1519_v61, 0.0  ;;  %v1520_v7 = vadd.f32 %v2469_v40, %v1449_v3 }
 0x161   : > { %1615 = vst.msk [vmem:[%s2480_s8 + $0x70] sm:$0xff] %vm272_vm3, %v1551_v4  ;;  %v1552_v10 = vmax.f32 %v1488_v6, 0.0 }
 0x162   : > { %1647 = vst.msk [vmem:[%s2480_s8 + $0x170] sm:$0xff] %vm272_vm3, %v1583_v5  ;;  %v1584_v11 = vmax.f32 %v1520_v7, 0.0  ;;  %v1087_v12 = vpop.f32.mrb[36].mxu0  ;;  %v1215_v13 = vpop.f32.mrb[36].mxu1  ;;  %v360_v7 = vld [vmem:[#allocation2 + $0xb8] sm:$0xff] }
 0x163   : > { %1616 = vst.msk [vmem:[%s2480_s8 + $0x78] sm:$0xff] %vm272_vm3, %v1552_v10  ;;  %v1288_v16 = vadd.f32 %v1087_v12, %v355_v8  ;;  %v1320_v17 = vadd.f32 %v1215_v13, %v387_v9  ;;  %v1089_v18 = vpop.f32.mrb[37].mxu0  ;;  %v1217_v19 = vpop.f32.mrb[37].mxu1  ;;  %v392_v8 = vld [vmem:[#allocation2 + $0x1b8] sm:$0xff] }
 0x164   : > { %1648 = vst.msk [vmem:[%s2480_s8 + $0x178] sm:$0xff] %vm272_vm3, %v1584_v11  ;;  %v1418_v20 = vld [vmem:[#allocation2 + $0x80] sm:$0xff]  ;;  %v1090_v22 = vpop.f32.mrb[38].mxu0  ;;  %v1218_v23 = vpop.f32.mrb[38].mxu1 }
 0x165   : > { %v1450_v21 = vld [vmem:[#allocation2 + $0x180] sm:$0xff]  ;;  %v1489_v24 = vadd.f32 %v2469_v40, %v1418_v20  ;;  %1353 = vst.msk [vmem:[#allocation2 + $0x90] sm:$0xff] %vm272_vm3, %v1288_v16  ;;  %1385 = vst.msk [vmem:[#allocation2 + $0x190] sm:$0xff] %vm272_vm3, %v1320_v17  ;;  %v1289_v26 = vadd.f32 %v1090_v22, %v356_v14  ;;  %v1321_v27 = vadd.f32 %v1218_v23, %v388_v15  ;;  %v1092_v28 = vpop.f32.mrb[39].mxu0  ;;  %v1220_v29 = vpop.f32.mrb[39].mxu1 }
 0x166   : > { %v1521_v25 = vadd.f32 %v2469_v40, %v1450_v21  ;;  %v1419_v30 = vld [vmem:[#allocation2 + $0x88] sm:$0xff]  ;;  %v361_v29 = vld [vmem:[#allocation2 + $0xc0] sm:$0xff] }
 0x167   : > { %v1451_v31 = vld [vmem:[#allocation2 + $0x188] sm:$0xff]  ;;  %v1553_v32 = vmax.f32 %v1489_v24, 0.0  ;;  %v1490_v34 = vadd.f32 %v2469_v40, %v1419_v30  ;;  %1354 = vst.msk [vmem:[#allocation2 + $0x98] sm:$0xff] %vm272_vm3, %v1289_v26  ;;  %1386 = vst.msk [vmem:[#allocation2 + $0x198] sm:$0xff] %vm272_vm3, %v1321_v27  ;;  %v393_v30 = vld [vmem:[#allocation2 + $0x1c0] sm:$0xff] }
 0x168   : > { %v1585_v33 = vmax.f32 %v1521_v25, 0.0  ;;  %v1522_v35 = vadd.f32 %v2469_v40, %v1451_v31 }
 0x169   : > { %1617 = vst.msk [vmem:[%s2480_s8 + $0x80] sm:$0xff] %vm272_vm3, %v1553_v32  ;;  %v1554_v38 = vmax.f32 %v1490_v34, 0.0 }
 0x16a   : > { %1649 = vst.msk [vmem:[%s2480_s8 + $0x180] sm:$0xff] %vm272_vm3, %v1585_v33  ;;  %v1586_v39 = vmax.f32 %v1522_v35, 0.0  ;;  %v1095_v41 = vpop.f32.mrb[40].mxu0  ;;  %v1223_v42 = vpop.f32.mrb[40].mxu1  ;;  %v362_v35 = vld [vmem:[#allocation2 + $0xc8] sm:$0xff] }
 0x16b   : > { %1618 = vst.msk [vmem:[%s2480_s8 + $0x88] sm:$0xff] %vm272_vm3, %v1554_v38  ;;  %v1290_v45 = vadd.f32 %v1095_v41, %v357_v36  ;;  %v1322_v46 = vadd.f32 %v1223_v42, %v389_v37  ;;  %v1097_v47 = vpop.f32.mrb[41].mxu0  ;;  %v1225_v48 = vpop.f32.mrb[41].mxu1  ;;  %v394_v36 = vld [vmem:[#allocation2 + $0x1c8] sm:$0xff] }
 0x16c   : > { %1650 = vst.msk [vmem:[%s2480_s8 + $0x188] sm:$0xff] %vm272_vm3, %v1586_v39  ;;  %v1420_v49 = vld [vmem:[#allocation2 + $0x90] sm:$0xff]  ;;  %v1098_v51 = vpop.f32.mrb[42].mxu0  ;;  %v1226_v52 = vpop.f32.mrb[42].mxu1 }
 0x16d   : > { %v1452_v50 = vld [vmem:[#allocation2 + $0x190] sm:$0xff]  ;;  %v1491_v53 = vadd.f32 %v2469_v40, %v1420_v49  ;;  %1355 = vst.msk [vmem:[#allocation2 + $0xa0] sm:$0xff] %vm272_vm3, %v1290_v45  ;;  %1387 = vst.msk [vmem:[#allocation2 + $0x1a0] sm:$0xff] %vm272_vm3, %v1322_v46  ;;  %v1291_v55 = vadd.f32 %v1098_v51, %v358_v43  ;;  %v1323_v56 = vadd.f32 %v1226_v52, %v390_v44  ;;  %v1100_v57 = vpop.f32.mrb[43].mxu0  ;;  %v1228_v58 = vpop.f32.mrb[43].mxu1 }
 0x16e   : > { %v1523_v54 = vadd.f32 %v2469_v40, %v1452_v50  ;;  %v1421_v59 = vld [vmem:[#allocation2 + $0x98] sm:$0xff]  ;;  %v363_v58 = vld [vmem:[#allocation2 + $0xd0] sm:$0xff] }
 0x16f   : > { %v1453_v60 = vld [vmem:[#allocation2 + $0x198] sm:$0xff]  ;;  %v1555_v61 = vmax.f32 %v1491_v53, 0.0  ;;  %v1492_v63 = vadd.f32 %v2469_v40, %v1421_v59  ;;  %1356 = vst.msk [vmem:[#allocation2 + $0xa8] sm:$0xff] %vm272_vm3, %v1291_v55  ;;  %1388 = vst.msk [vmem:[#allocation2 + $0x1a8] sm:$0xff] %vm272_vm3, %v1323_v56  ;;  %v395_v59 = vld [vmem:[#allocation2 + $0x1d0] sm:$0xff] }
 0x170   : > { %v1587_v62 = vmax.f32 %v1523_v54, 0.0  ;;  %v1524_v0 = vadd.f32 %v2469_v40, %v1453_v60 }
 0x171   : > { %1619 = vst.msk [vmem:[%s2480_s8 + $0x90] sm:$0xff] %vm272_vm3, %v1555_v61  ;;  %v1556_v3 = vmax.f32 %v1492_v63, 0.0 }
 0x172   : > { %1651 = vst.msk [vmem:[%s2480_s8 + $0x190] sm:$0xff] %vm272_vm3, %v1587_v62  ;;  %v1588_v4 = vmax.f32 %v1524_v0, 0.0  ;;  %v1103_v5 = vpop.f32.mrb[44].mxu0  ;;  %v1231_v6 = vpop.f32.mrb[44].mxu1  ;;  %v364_v0 = vld [vmem:[#allocation2 + $0xd8] sm:$0xff] }
 0x173   : > { %1620 = vst.msk [vmem:[%s2480_s8 + $0x98] sm:$0xff] %vm272_vm3, %v1556_v3  ;;  %v1292_v9 = vadd.f32 %v1103_v5, %v359_v1  ;;  %v1324_v10 = vadd.f32 %v1231_v6, %v391_v2  ;;  %v1105_v11 = vpop.f32.mrb[45].mxu0  ;;  %v1233_v12 = vpop.f32.mrb[45].mxu1  ;;  %v396_v1 = vld [vmem:[#allocation2 + $0x1d8] sm:$0xff] }
 0x174   : > { %1652 = vst.msk [vmem:[%s2480_s8 + $0x198] sm:$0xff] %vm272_vm3, %v1588_v4  ;;  %v1422_v13 = vld [vmem:[#allocation2 + $0xa0] sm:$0xff]  ;;  %v1106_v15 = vpop.f32.mrb[46].mxu0  ;;  %v1234_v16 = vpop.f32.mrb[46].mxu1 }
 0x175   : > { %v1454_v14 = vld [vmem:[#allocation2 + $0x1a0] sm:$0xff]  ;;  %v1493_v17 = vadd.f32 %v2469_v40, %v1422_v13  ;;  %1357 = vst.msk [vmem:[#allocation2 + $0xb0] sm:$0xff] %vm272_vm3, %v1292_v9  ;;  %1389 = vst.msk [vmem:[#allocation2 + $0x1b0] sm:$0xff] %vm272_vm3, %v1324_v10  ;;  %v1293_v19 = vadd.f32 %v1106_v15, %v360_v7  ;;  %v1325_v20 = vadd.f32 %v1234_v16, %v392_v8  ;;  %v1108_v21 = vpop.f32.mrb[47].mxu0  ;;  %v1236_v22 = vpop.f32.mrb[47].mxu1 }
 0x176   : > { %v1525_v18 = vadd.f32 %v2469_v40, %v1454_v14  ;;  %v1423_v23 = vld [vmem:[#allocation2 + $0xa8] sm:$0xff]  ;;  %v365_v22 = vld [vmem:[#allocation2 + $0xe0] sm:$0xff] }
 0x177   : > { %v1455_v24 = vld [vmem:[#allocation2 + $0x1a8] sm:$0xff]  ;;  %v1557_v25 = vmax.f32 %v1493_v17, 0.0  ;;  %v1494_v27 = vadd.f32 %v2469_v40, %v1423_v23  ;;  %1358 = vst.msk [vmem:[#allocation2 + $0xb8] sm:$0xff] %vm272_vm3, %v1293_v19  ;;  %1390 = vst.msk [vmem:[#allocation2 + $0x1b8] sm:$0xff] %vm272_vm3, %v1325_v20  ;;  %v397_v23 = vld [vmem:[#allocation2 + $0x1e0] sm:$0xff] }
 0x178   : > { %v1589_v26 = vmax.f32 %v1525_v18, 0.0  ;;  %v1526_v28 = vadd.f32 %v2469_v40, %v1455_v24 }
 0x179   : > { %1621 = vst.msk [vmem:[%s2480_s8 + $0xa0] sm:$0xff] %vm272_vm3, %v1557_v25  ;;  %v1558_v31 = vmax.f32 %v1494_v27, 0.0 }
 0x17a   : > { %1653 = vst.msk [vmem:[%s2480_s8 + $0x1a0] sm:$0xff] %vm272_vm3, %v1589_v26  ;;  %v1590_v32 = vmax.f32 %v1526_v28, 0.0  ;;  %v1111_v33 = vpop.f32.mrb[48].mxu0  ;;  %v1239_v34 = vpop.f32.mrb[48].mxu1  ;;  %v366_v28 = vld [vmem:[#allocation2 + $0xe8] sm:$0xff] }
 0x17b   : > { %1622 = vst.msk [vmem:[%s2480_s8 + $0xa8] sm:$0xff] %vm272_vm3, %v1558_v31  ;;  %v1294_v37 = vadd.f32 %v1111_v33, %v361_v29  ;;  %v1326_v38 = vadd.f32 %v1239_v34, %v393_v30  ;;  %v1113_v39 = vpop.f32.mrb[49].mxu0  ;;  %v1241_v41 = vpop.f32.mrb[49].mxu1  ;;  %v398_v29 = vld [vmem:[#allocation2 + $0x1e8] sm:$0xff] }
 0x17c   : > { %1654 = vst.msk [vmem:[%s2480_s8 + $0x1a8] sm:$0xff] %vm272_vm3, %v1590_v32  ;;  %v1424_v42 = vld [vmem:[#allocation2 + $0xb0] sm:$0xff]  ;;  %v1114_v44 = vpop.f32.mrb[50].mxu0  ;;  %v1242_v45 = vpop.f32.mrb[50].mxu1 }
 0x17d   : > { %v1456_v43 = vld [vmem:[#allocation2 + $0x1b0] sm:$0xff]  ;;  %v1495_v46 = vadd.f32 %v2469_v40, %v1424_v42  ;;  %1359 = vst.msk [vmem:[#allocation2 + $0xc0] sm:$0xff] %vm272_vm3, %v1294_v37  ;;  %1391 = vst.msk [vmem:[#allocation2 + $0x1c0] sm:$0xff] %vm272_vm3, %v1326_v38  ;;  %v1295_v48 = vadd.f32 %v1114_v44, %v362_v35  ;;  %v1327_v49 = vadd.f32 %v1242_v45, %v394_v36  ;;  %v1116_v50 = vpop.f32.mrb[51].mxu0  ;;  %v1244_v51 = vpop.f32.mrb[51].mxu1 }
 0x17e   : > { %v1527_v47 = vadd.f32 %v2469_v40, %v1456_v43  ;;  %v1425_v52 = vld [vmem:[#allocation2 + $0xb8] sm:$0xff]  ;;  %v367_v51 = vld [vmem:[#allocation2 + $0xf0] sm:$0xff] }
 0x17f   : > { %v1457_v53 = vld [vmem:[#allocation2 + $0x1b8] sm:$0xff]  ;;  %v1559_v54 = vmax.f32 %v1495_v46, 0.0  ;;  %v1496_v56 = vadd.f32 %v2469_v40, %v1425_v52  ;;  %1360 = vst.msk [vmem:[#allocation2 + $0xc8] sm:$0xff] %vm272_vm3, %v1295_v48  ;;  %1392 = vst.msk [vmem:[#allocation2 + $0x1c8] sm:$0xff] %vm272_vm3, %v1327_v49  ;;  %v399_v52 = vld [vmem:[#allocation2 + $0x1f0] sm:$0xff] }
 0x180   : > { %v1591_v55 = vmax.f32 %v1527_v47, 0.0  ;;  %v1528_v57 = vadd.f32 %v2469_v40, %v1457_v53 }
 0x181   : > { %1623 = vst.msk [vmem:[%s2480_s8 + $0xb0] sm:$0xff] %vm272_vm3, %v1559_v54  ;;  %v1560_v60 = vmax.f32 %v1496_v56, 0.0 }
 0x182   : > { %1655 = vst.msk [vmem:[%s2480_s8 + $0x1b0] sm:$0xff] %vm272_vm3, %v1591_v55  ;;  %v1592_v61 = vmax.f32 %v1528_v57, 0.0  ;;  %v1119_v62 = vpop.f32.mrb[52].mxu0  ;;  %v1247_v63 = vpop.f32.mrb[52].mxu1  ;;  %v368_v57 = vld [vmem:[#allocation2 + $0xf8] sm:$0xff] }
 0x183   : > { %1624 = vst.msk [vmem:[%s2480_s8 + $0xb8] sm:$0xff] %vm272_vm3, %v1560_v60  ;;  %v1296_v2 = vadd.f32 %v1119_v62, %v363_v58  ;;  %v1328_v3 = vadd.f32 %v1247_v63, %v395_v59  ;;  %v1121_v4 = vpop.f32.mrb[53].mxu0  ;;  %v1249_v5 = vpop.f32.mrb[53].mxu1  ;;  %v400_v58 = vld [vmem:[#allocation2 + $0x1f8] sm:$0xff] }
 0x184   : > { %1656 = vst.msk [vmem:[%s2480_s8 + $0x1b8] sm:$0xff] %vm272_vm3, %v1592_v61  ;;  %v1426_v6 = vld [vmem:[#allocation2 + $0xc0] sm:$0xff]  ;;  %v1122_v8 = vpop.f32.mrb[54].mxu0  ;;  %v1250_v9 = vpop.f32.mrb[54].mxu1 }
 0x185   : > { %v1458_v7 = vld [vmem:[#allocation2 + $0x1c0] sm:$0xff]  ;;  %v1497_v10 = vadd.f32 %v2469_v40, %v1426_v6  ;;  %1361 = vst.msk [vmem:[#allocation2 + $0xd0] sm:$0xff] %vm272_vm3, %v1296_v2  ;;  %1393 = vst.msk [vmem:[#allocation2 + $0x1d0] sm:$0xff] %vm272_vm3, %v1328_v3  ;;  %v1297_v12 = vadd.f32 %v1122_v8, %v364_v0  ;;  %v1329_v13 = vadd.f32 %v1250_v9, %v396_v1  ;;  %v1124_v14 = vpop.f32.mrb[55].mxu0  ;;  %v1252_v15 = vpop.f32.mrb[55].mxu1 }
 0x186   : > { %v1529_v11 = vadd.f32 %v2469_v40, %v1458_v7  ;;  %v1427_v16 = vld [vmem:[#allocation2 + $0xc8] sm:$0xff]  ;;  %v2078_v2 = vld [vmem:[%s2736_s2] ss:$0 sm:$0xff] }
 0x187   : > { %v1459_v17 = vld [vmem:[#allocation2 + $0x1c8] sm:$0xff]  ;;  %v1561_v18 = vmax.f32 %v1497_v10, 0.0  ;;  %v1498_v20 = vadd.f32 %v2469_v40, %v1427_v16  ;;  %1362 = vst.msk [vmem:[#allocation2 + $0xd8] sm:$0xff] %vm272_vm3, %v1297_v12  ;;  %1394 = vst.msk [vmem:[#allocation2 + $0x1d8] sm:$0xff] %vm272_vm3, %v1329_v13 }
 0x188   : > { %v1593_v19 = vmax.f32 %v1529_v11, 0.0  ;;  %v1530_v21 = vadd.f32 %v2469_v40, %v1459_v17 }
 0x189   : > { %1625 = vst.msk [vmem:[%s2480_s8 + $0xc0] sm:$0xff] %vm272_vm3, %v1561_v18  ;;  %v1562_v24 = vmax.f32 %v1498_v20, 0.0 }
 0x18a   : > { %1657 = vst.msk [vmem:[%s2480_s8 + $0x1c0] sm:$0xff] %vm272_vm3, %v1593_v19  ;;  %v1594_v25 = vmax.f32 %v1530_v21, 0.0  ;;  %v1127_v26 = vpop.f32.mrb[56].mxu0  ;;  %v1255_v27 = vpop.f32.mrb[56].mxu1 }
 0x18b   : > { %1626 = vst.msk [vmem:[%s2480_s8 + $0xc8] sm:$0xff] %vm272_vm3, %v1562_v24  ;;  %v1298_v30 = vadd.f32 %v1127_v26, %v365_v22  ;;  %v1330_v31 = vadd.f32 %v1255_v27, %v397_v23  ;;  %v1129_v32 = vpop.f32.mrb[57].mxu0  ;;  %v1257_v33 = vpop.f32.mrb[57].mxu1 }
 0x18c   : > { %1658 = vst.msk [vmem:[%s2480_s8 + $0x1c8] sm:$0xff] %vm272_vm3, %v1594_v25  ;;  %v1428_v34 = vld [vmem:[#allocation2 + $0xd0] sm:$0xff]  ;;  %v1130_v36 = vpop.f32.mrb[58].mxu0  ;;  %v1258_v37 = vpop.f32.mrb[58].mxu1 }
 0x18d   : > { %v1460_v35 = vld [vmem:[#allocation2 + $0x1d0] sm:$0xff]  ;;  %v1499_v38 = vadd.f32 %v2469_v40, %v1428_v34  ;;  %1363 = vst.msk [vmem:[#allocation2 + $0xe0] sm:$0xff] %vm272_vm3, %v1298_v30  ;;  %1395 = vst.msk [vmem:[#allocation2 + $0x1e0] sm:$0xff] %vm272_vm3, %v1330_v31  ;;  %v1299_v41 = vadd.f32 %v1130_v36, %v366_v28  ;;  %v1331_v42 = vadd.f32 %v1258_v37, %v398_v29  ;;  %v1132_v43 = vpop.f32.mrb[59].mxu0  ;;  %v1260_v44 = vpop.f32.mrb[59].mxu1 }
 0x18e   : > { %v1531_v39 = vadd.f32 %v2469_v40, %v1460_v35  ;;  %v1429_v45 = vld [vmem:[#allocation2 + $0xd8] sm:$0xff] }
 0x18f   : > { %v1461_v46 = vld [vmem:[#allocation2 + $0x1d8] sm:$0xff]  ;;  %v1563_v47 = vmax.f32 %v1499_v38, 0.0  ;;  %v1500_v49 = vadd.f32 %v2469_v40, %v1429_v45  ;;  %1364 = vst.msk [vmem:[#allocation2 + $0xe8] sm:$0xff] %vm272_vm3, %v1299_v41  ;;  %1396 = vst.msk [vmem:[#allocation2 + $0x1e8] sm:$0xff] %vm272_vm3, %v1331_v42 }
 0x190   : > { %v1595_v48 = vmax.f32 %v1531_v39, 0.0  ;;  %v1532_v50 = vadd.f32 %v2469_v40, %v1461_v46 }
 0x191   : > { %1627 = vst.msk [vmem:[%s2480_s8 + $0xd0] sm:$0xff] %vm272_vm3, %v1563_v47  ;;  %v1564_v53 = vmax.f32 %v1500_v49, 0.0 }
 0x192   : > { %1659 = vst.msk [vmem:[%s2480_s8 + $0x1d0] sm:$0xff] %vm272_vm3, %v1595_v48  ;;  %v1596_v54 = vmax.f32 %v1532_v50, 0.0  ;;  %v1135_v55 = vpop.f32.mrb[60].mxu0  ;;  %v1263_v56 = vpop.f32.mrb[60].mxu1 }
 0x193   : > { %1628 = vst.msk [vmem:[%s2480_s8 + $0xd8] sm:$0xff] %vm272_vm3, %v1564_v53  ;;  %v1300_v40 = vadd.f32 %v1135_v55, %v367_v51  ;;  %v1332_v59 = vadd.f32 %v1263_v56, %v399_v52  ;;  %v1137_v60 = vpop.f32.mrb[61].mxu0  ;;  %v1265_v61 = vpop.f32.mrb[61].mxu1 }
 0x194   : > { %1660 = vst.msk [vmem:[%s2480_s8 + $0x1d8] sm:$0xff] %vm272_vm3, %v1596_v54  ;;  %v1430_v62 = vld [vmem:[#allocation2 + $0xe0] sm:$0xff]  ;;  %v1138_v0 = vpop.f32.mrb[62].mxu0  ;;  %v1266_v1 = vpop.f32.mrb[62].mxu1 }
 0x195   : > { %v1462_v63 = vld [vmem:[#allocation2 + $0x1e0] sm:$0xff]  ;;  %v1501_v3 = vadd.f32 %v2078_v2, %v1430_v62  ;;  %1365 = vst.msk [vmem:[#allocation2 + $0xf0] sm:$0xff] %vm272_vm3, %v1300_v40  ;;  %1397 = vst.msk [vmem:[#allocation2 + $0x1f0] sm:$0xff] %vm272_vm3, %v1332_v59  ;;  %v1301_v5 = vadd.f32 %v1138_v0, %v368_v57  ;;  %v1333_v6 = vadd.f32 %v1266_v1, %v400_v58  ;;  %v1140_v7 = vpop.f32.mrb[63].mxu0  ;;  %v1268_v8 = vpop.f32.mrb[63].mxu1 }
 0x196   : > { %v1533_v4 = vadd.f32 %v2078_v2, %v1462_v63  ;;  %v1431_v9 = vld [vmem:[#allocation2 + $0xe8] sm:$0xff] }
 0x197   : > { %v1463_v10 = vld [vmem:[#allocation2 + $0x1e8] sm:$0xff]  ;;  %v1565_v11 = vmax.f32 %v1501_v3, 0.0  ;;  %v1502_v13 = vadd.f32 %v2078_v2, %v1431_v9  ;;  %1366 = vst.msk [vmem:[#allocation2 + $0xf8] sm:$0xff] %vm272_vm3, %v1301_v5  ;;  %1398 = vst.msk [vmem:[#allocation2 + $0x1f8] sm:$0xff] %vm272_vm3, %v1333_v6 }
 0x198   : > { %v1597_v12 = vmax.f32 %v1533_v4, 0.0  ;;  %v1534_v14 = vadd.f32 %v2078_v2, %v1463_v10 }
 0x199   : > { %1629 = vst.msk [vmem:[%s2480_s8 + $0xe0] sm:$0xff] %vm272_vm3, %v1565_v11  ;;  %v1566_v15 = vmax.f32 %v1502_v13, 0.0 }
 0x19a   : > { %1661 = vst.msk [vmem:[%s2480_s8 + $0x1e0] sm:$0xff] %vm272_vm3, %v1597_v12  ;;  %v1598_v16 = vmax.f32 %v1534_v14, 0.0 }
 0x19b   : > { %1630 = vst.msk [vmem:[%s2480_s8 + $0xe8] sm:$0xff] %vm272_vm3, %v1566_v15 }
 0x19c   : > { %1662 = vst.msk [vmem:[%s2480_s8 + $0x1e8] sm:$0xff] %vm272_vm3, %v1598_v16  ;;  %v1432_v17 = vld [vmem:[#allocation2 + $0xf0] sm:$0xff] }
 0x19d   : > { %v1464_v18 = vld [vmem:[#allocation2 + $0x1f0] sm:$0xff]  ;;  %v1503_v19 = vadd.f32 %v2078_v2, %v1432_v17 }
 0x19e   : > { %v1535_v20 = vadd.f32 %v2078_v2, %v1464_v18  ;;  %v1433_v21 = vld [vmem:[#allocation2 + $0xf8] sm:$0xff] }
 0x19f   : > { %v1465_v22 = vld [vmem:[#allocation2 + $0x1f8] sm:$0xff]  ;;  %v1567_v23 = vmax.f32 %v1503_v19, 0.0  ;;  %v1504_v25 = vadd.f32 %v2078_v2, %v1433_v21 }
 0x1a0   : > { %v1599_v24 = vmax.f32 %v1535_v20, 0.0  ;;  %v1536_v26 = vadd.f32 %v2078_v2, %v1465_v22 }
 0x1a1   : > { %1631 = vst.msk [vmem:[%s2480_s8 + $0xf0] sm:$0xff] %vm272_vm3, %v1567_v23  ;;  %v1568_v27 = vmax.f32 %v1504_v25, 0.0 }
 0x1a2   : > { %1663 = vst.msk [vmem:[%s2480_s8 + $0x1f0] sm:$0xff] %vm272_vm3, %v1599_v24  ;;  %v1600_v28 = vmax.f32 %v1536_v26, 0.0 }
 0x1a3   : > { %1632 = vst.msk [vmem:[%s2480_s8 + $0xf8] sm:$0xff] %vm272_vm3, %v1568_v27 }
 0x1a4   : > { %1664 = vst.msk [vmem:[%s2480_s8 + $0x1f8] sm:$0xff] %vm272_vm3, %v1600_v28 }
 0x1a5 PF: > { %s13_s14 = sadd.s32 1, %s2101_s14   ;;  %s2738_s12 = smov %s2097_s13 }
 0x1a6   : > { %p10_p5 = scmp.ge.s32.totalorder %s13_s14, 10   ;;  %s2739_s13 = smov %s2741_s15 }
 0x1a8   :  { %12 = sbr.rel (!%p10_p5) target bundleno = 2 (0x2), region = 76 }

</bundles_post_ra>
